<compile_context>
chip_gen: v7x
topology: tpu7x:2x2x1
jax: 0.10.0
libtpu: 0.0.40
codegen_flags: <defaults>
</compile_context>

<pallas_src>
import jax
import jax.numpy as jnp
import numpy as np
from jax.experimental import pallas as pl
from jax.experimental.pallas import tpu as pltpu


def _round_up(x, m):
    return (x + m - 1) // m * m


def make_dblock_call(Cin, Ch, Cout, H, W, L2, batch_tile, learnable_sc,
                     n_blocks, compute_dtype):
    Wp = W + 2
    BL2 = batch_tile * L2
    OFF = _round_up(Wp + 1, 128)     # lane-aligned halo, covers |d| <= Wp+1 for any W
    Cmax = max(Cin, Ch)
    taps = [(ky, kx) for ky in range(3) for kx in range(3)]
    cdt = compute_dtype

    def kernel(*refs):
        it = iter(refs)
        x_ref = next(it)             # (Cin, BL2)   f32 padded/flattened input slab
        w1_ref = next(it)            # (9, Ch, Cin)   compute_dtype
        b1_ref = next(it)            # (Ch, 1)        f32
        w2_ref = next(it)            # (9, Cout, Ch)  compute_dtype
        b2_ref = next(it)            # (Cout, 1)      f32
        if learnable_sc:
            wsc_ref = next(it)       # (Cout, Cin)    compute_dtype
            bsc_ref = next(it)       # (Cout, 1)      f32
        mask_ref = next(it)          # (1, BL2) f32, block-invariant (resident)
        o_ref = next(it)             # (Cout, BL2) f32
        ext = next(it)               # (Cmax, OFF + BL2 + OFF) compute_dtype scratch

        xv = x_ref[...]              # loaded once; also reused by the shortcut
        mask = mask_ref[...]

        # Keep the OFF margins finite: they only ever feed masked / discarded
        # pad outputs, but NaN/Inf garbage would leak through `* mask`.
        zm = jnp.zeros((Cmax, OFF), cdt)
        ext[:, 0:OFF] = zm
        ext[:, OFF + BL2:OFF + BL2 + OFF] = zm

        # ---- conv1: relu(x) once into scratch, 9 per-tap MXU dots ----------
        ext[0:Cin, OFF:OFF + BL2] = jnp.maximum(xv, 0.0).astype(cdt)
        acc1 = None
        for t, (ky, kx) in enumerate(taps):
            d = (ky - 1) * Wp + (kx - 1)
            rhs = ext[0:Cin, OFF + d:OFF + d + BL2]
            p = jnp.dot(w1_ref[t], rhs, preferred_element_type=jnp.float32)
            acc1 = p if acc1 is None else acc1 + p
        # Zero everything outside the true interior so conv2 sees pad=1 zeros.
        h1 = jnp.maximum(acc1 + b1_ref[...], 0.0) * mask            # (Ch, BL2) f32

        # ---- conv2: reuse the same scratch (relu(x) rows are dead now) -----
        ext[0:Ch, OFF:OFF + BL2] = h1.astype(cdt)
        acc2 = None
        for t, (ky, kx) in enumerate(taps):
            d = (ky - 1) * Wp + (kx - 1)
            rhs = ext[0:Ch, OFF + d:OFF + d + BL2]
            p = jnp.dot(w2_ref[t], rhs, preferred_element_type=jnp.float32)
            acc2 = p if acc2 is None else acc2 + p
        h2 = acc2 + b2_ref[...]                                      # (Cout, BL2)

        # ---- shortcut: 1x1 conv on the already-loaded raw x block ----------
        if learnable_sc:
            sc = jnp.dot(wsc_ref[...], xv.astype(cdt),
                         preferred_element_type=jnp.float32) + bsc_ref[...]
        else:
            sc = xv                   # Cin == Cout in this branch

        # Residual + shortcut on the padded slab; un-pad / avg-pool (linear)
        # are applied in the wrapper.  Full-block, lane-aligned store.
        o_ref[...] = (h2 + sc).astype(o_ref.dtype)

    in_specs = [
        pl.BlockSpec((Cin, BL2), lambda n: (0, n)),
        pl.BlockSpec((9, Ch, Cin), lambda n: (0, 0, 0)),
        pl.BlockSpec((Ch, 1), lambda n: (0, 0)),
        pl.BlockSpec((9, Cout, Ch), lambda n: (0, 0, 0)),
        pl.BlockSpec((Cout, 1), lambda n: (0, 0)),
    ]
    if learnable_sc:
        in_specs += [pl.BlockSpec((Cout, Cin), lambda n: (0, 0)),
                     pl.BlockSpec((Cout, 1), lambda n: (0, 0))]
    in_specs += [pl.BlockSpec((1, BL2), lambda n: (0, 0))]   # resident mask

    # Explicit VMEM budget: double-buffered blocks + scratch + headroom for
    # compiler-managed live values (acc1/h1/acc2/sc/...).
    cb = jnp.dtype(cdt).itemsize
    vmem_est = (
        2 * Cin * BL2 * 4
        + 2 * Cout * BL2 * 4
        + 2 * 1 * BL2 * 4
        + 2 * (9 * Ch * Cin + 9 * Cout * Ch + Cout * Cin) * cb
        + Cmax * (OFF + BL2 + OFF) * cb
        + (2 * Cin + 3 * Ch + 3 * Cout) * BL2 * 4
    )
    vmem_limit = int(min(64 * 1024 * 1024, max(4 * 1024 * 1024, 2 * vmem_est)))

    return pl.pallas_call(
        kernel,
        out_shape=jax.ShapeDtypeStruct((Cout, n_blocks * BL2), jnp.float32),
        grid_spec=pltpu.PrefetchScalarGridSpec(
            num_scalar_prefetch=0,
            grid=(n_blocks,),
            in_specs=in_specs,
            out_specs=pl.BlockSpec((Cout, BL2), lambda n: (0, n)),
            scratch_shapes=[pltpu.VMEM((Cmax, OFF + BL2 + OFF), cdt)]),
        compiler_params=pltpu.CompilerParams(
            dimension_semantics=("parallel",),   # batch axis -> both TCs on v7x
            vmem_limit_bytes=vmem_limit),
    )


def dblock_forward(x_nchw, params, downsample, *, batch_tile=None,
                   compute_dtype=jnp.float32):
    """NCHW in / NCHW out; matches DBlock.forward.

    For production channel counts on v6e/v7x pass compute_dtype=jnp.bfloat16
    (matmul operands bf16, accumulation f32, elementwise stays f32).
    """
    N, Cin, H, W = x_nchw.shape
    w1, b1 = params["w1"], params["b1"]
    w2, b2 = params["w2"], params["b2"]
    Ch, Cout = w1.shape[0], w2.shape[0]
    learnable_sc = (Cin != Cout) or downsample
    if downsample:
        assert H % 2 == 0 and W % 2 == 0, "downsample requires even H, W"
    if not learnable_sc:
        assert Cin == Cout

    Hp, Wp = H + 2, W + 2
    L = Hp * Wp                          # one zero-padded image, flattened
    L2 = _round_up(L, 128)               # lane-aligned per-image slab length
    if batch_tile is None:
        # >= 2 grid steps whenever N >= 2: feeds both v7x TCs + the DMA pipeline.
        batch_tile = max(1, min(8, (N + 1) // 2))
    Np = _round_up(N, batch_tile)
    n_blocks = Np // batch_tile

    # Input slab (Cin, Np*L2): spatial pad=1, flatten, pad lanes/batch with zeros.
    xp = jnp.pad(x_nchw.astype(jnp.float32),
                 ((0, Np - N), (0, 0), (1, 1), (1, 1)))           # (Np,Cin,Hp,Wp)
    xp = jnp.pad(xp.reshape(Np, Cin, L), ((0, 0), (0, 0), (0, L2 - L)))
    x_slab = jnp.transpose(xp, (1, 0, 2)).reshape(Cin, Np * L2)

    # Block-invariant interior mask (1.0 at true pixels, 0.0 at pad ring /
    # lane pad) for ONE batch tile: identical for every grid step -> resident.
    idx = np.arange(L2)
    row, col = idx // Wp, idx % Wp
    m = (idx < L) & (row >= 1) & (row <= H) & (col >= 1) & (col <= W)
    mask = jnp.asarray(np.tile(m.astype(np.float32), batch_tile)
                       ).reshape(1, batch_tile * L2)

    # Weights: OIHW -> (ky, kx, O, I) -> (9, O, I), pre-cast to compute_dtype.
    w1m = jnp.transpose(w1, (2, 3, 0, 1)).reshape(9, Ch, Cin).astype(compute_dtype)
    w2m = jnp.transpose(w2, (2, 3, 0, 1)).reshape(9, Cout, Ch).astype(compute_dtype)
    args = [x_slab, w1m, b1.reshape(Ch, 1).astype(jnp.float32),
            w2m, b2.reshape(Cout, 1).astype(jnp.float32)]
    if learnable_sc:
        args += [params["wsc"][:, :, 0, 0].astype(compute_dtype),
                 params["bsc"].reshape(Cout, 1).astype(jnp.float32)]
    args += [mask]

    call = make_dblock_call(Cin, Ch, Cout, H, W, L2, batch_tile, learnable_sc,
                            n_blocks, compute_dtype)
    y_slab = call(*args)                                      # (Cout, Np*L2)

    # Un-pad (pure layout) and, if downsampling, the (linear) 2x2 average pool.
    y = y_slab.reshape(Cout, Np, L2)[:, :N, :L]
    y = jnp.transpose(y, (1, 0, 2)).reshape(N, Cout, Hp, Wp)[:, :, 1:H + 1, 1:W + 1]
    if downsample:
        y = y.reshape(N, Cout, H // 2, 2, W // 2, 2).mean(axis=(3, 5))
    return y


# ------------------------- pure-JAX reference -------------------------------
def _conv_ref(x, w, b, pad):
    y = jax.lax.conv_general_dilated(
        x, w, window_strides=(1, 1), padding=[(pad, pad), (pad, pad)],
        dimension_numbers=("NCHW", "OIHW", "NCHW"))
    return y + b[None, :, None, None]


def _avg_pool2_ref(x):
    N, C, H, W = x.shape
    return x.reshape(N, C, H // 2, 2, W // 2, 2).mean(axis=(3, 5))


def dblock_ref(x, params, downsample):
    Cin = x.shape[1]
    Cout = params["w2"].shape[0]
    learnable_sc = (Cin != Cout) or downsample
    h = jnp.maximum(x, 0.0)
    h = _conv_ref(h, params["w1"], params["b1"], 1)
    h = jnp.maximum(h, 0.0)
    h = _conv_ref(h, params["w2"], params["b2"], 1)
    if downsample:
        h = _avg_pool2_ref(h)
    if learnable_sc:
        s = _conv_ref(x, params["wsc"], params["bsc"], 0)
        if downsample:
            s = _avg_pool2_ref(s)
    else:
        s = x
    return h + s


# ------------------------- deterministic init -------------------------------
def xavier_uniform(key, shape):
    cout, cin, kh, kw = shape
    fan_in, fan_out = cin * kh * kw, cout * kh * kw
    bound = float(np.sqrt(6.0 / (fan_in + fan_out)))
    return jax.random.uniform(key, shape, jnp.float32, -bound, bound)


if __name__ == "__main__":
    key = jax.random.PRNGKey(0)
    k = jax.random.split(key, 12)

    # ---- config A: downsample + channel change (learnable shortcut) ----
    N, Cin, Cout, H, W = 4, 4, 8, 16, 16
    Ch = Cout                                 # hidden_channels defaults to out
    params_a = {
        "w1": xavier_uniform(k[0], (Ch, Cin, 3, 3)),
        "b1": 0.1 * jax.random.normal(k[1], (Ch,), jnp.float32),
        "w2": xavier_uniform(k[2], (Cout, Ch, 3, 3)),
        "b2": 0.1 * jax.random.normal(k[3], (Cout,), jnp.float32),
        "wsc": xavier_uniform(k[4], (Cout, Cin, 1, 1)),
        "bsc": 0.1 * jax.random.normal(k[5], (Cout,), jnp.float32),
    }
    x_a = jax.random.normal(k[6], (N, Cin, H, W), jnp.float32)

    out_a = jax.block_until_ready(
        dblock_forward(x_a, params_a, True, batch_tile=2))
    ref_a = dblock_ref(x_a, params_a, True)
    assert out_a.shape == (N, Cout, H // 2, W // 2), out_a.shape
    err_a = float(jnp.max(jnp.abs(out_a - ref_a)))
    assert jnp.allclose(out_a, ref_a, atol=1e-4, rtol=1e-4), f"A err={err_a}"

    # ---- config B: no downsample, Cin == Cout (identity shortcut) ----
    Nb, Cb = 2, 8
    params_b = {
        "w1": xavier_uniform(k[7], (Cb, Cb, 3, 3)),
        "b1": 0.1 * jax.random.normal(k[8], (Cb,), jnp.float32),
        "w2": xavier_uniform(k[9], (Cb, Cb, 3, 3)),
        "b2": 0.1 * jax.random.normal(k[10], (Cb,), jnp.float32),
    }
    x_b = jax.random.normal(k[11], (Nb, Cb, H, W), jnp.float32)

    out_b = jax.block_until_ready(dblock_forward(x_b, params_b, False))
    ref_b = dblock_ref(x_b, params_b, False)
    assert out_b.shape == (Nb, Cb, H, W), out_b.shape
    err_b = float(jnp.max(jnp.abs(out_b - ref_b)))
    assert jnp.allclose(out_b, ref_b, atol=1e-4, rtol=1e-4), f"B err={err_b}"

    # ---- bf16 matmul operands (f32 accumulation), loose tolerance ----
    # Note: the identity-free (learnable) config; shortcut operands are bf16,
    # elementwise stays f32 — asymmetric vs. the f32 reference by design.
    out_bf = jax.block_until_ready(
        dblock_forward(x_a, params_a, True, batch_tile=2,
                       compute_dtype=jnp.bfloat16))
    err_bf = float(jnp.max(jnp.abs(out_bf - ref_a)))
    assert jnp.allclose(out_bf, ref_a, atol=2e-1, rtol=2e-1), f"bf16 err={err_bf}"

    print("KERNEL_OK")
</pallas_src>

<mosaic_0001>
module attributes {stable_mosaic.version = 11 : i64} {
  func.func @kernel(%arg0: i32, %arg1: memref<4x768xf32, #tpu.memory_space<vmem>>, %arg2: memref<9x8x4xf32, #tpu.memory_space<vmem>>, %arg3: memref<8x1xf32, #tpu.memory_space<vmem>>, %arg4: memref<9x8x8xf32, #tpu.memory_space<vmem>>, %arg5: memref<8x1xf32, #tpu.memory_space<vmem>>, %arg6: memref<8x4xf32, #tpu.memory_space<vmem>>, %arg7: memref<8x1xf32, #tpu.memory_space<vmem>>, %arg8: memref<1x768xf32, #tpu.memory_space<vmem>>, %arg9: memref<8x768xf32, #tpu.memory_space<vmem>>, %arg10: memref<8x1024xf32, #tpu.memory_space<vmem>>) attributes {dimension_semantics = [#tpu.dimension_semantics<parallel>], iteration_bounds = array<i64: 2>, scalar_prefetch = 0 : i64, scratch_operands = 1 : i64, tpu.core_type = #tpu.core_type<tc>, window_params = [{transform_indices = @transform_0, window_bounds = array<i64: 4, 768>}, {pipeline_mode = #tpu.pipeline_mode<synchronous>, transform_indices = @transform_1, window_bounds = array<i64: 9, 8, 4>}, {pipeline_mode = #tpu.pipeline_mode<synchronous>, transform_indices = @transform_2, window_bounds = array<i64: 8, 1>}, {pipeline_mode = #tpu.pipeline_mode<synchronous>, transform_indices = @transform_3, window_bounds = array<i64: 9, 8, 8>}, {pipeline_mode = #tpu.pipeline_mode<synchronous>, transform_indices = @transform_4, window_bounds = array<i64: 8, 1>}, {pipeline_mode = #tpu.pipeline_mode<synchronous>, transform_indices = @transform_5, window_bounds = array<i64: 8, 4>}, {pipeline_mode = #tpu.pipeline_mode<synchronous>, transform_indices = @transform_6, window_bounds = array<i64: 8, 1>}, {pipeline_mode = #tpu.pipeline_mode<synchronous>, transform_indices = @transform_7, window_bounds = array<i64: 1, 768>}, {transform_indices = @transform_8, window_bounds = array<i64: 8, 768>}]} {
    %c0 = arith.constant 0 : index
    %c0_0 = arith.constant 0 : index
    %0 = vector.load %arg1[%c0, %c0_0] : memref<4x768xf32, #tpu.memory_space<vmem>>, vector<4x768xf32>
    %c0_1 = arith.constant 0 : index
    %c0_2 = arith.constant 0 : index
    %1 = vector.load %arg8[%c0_1, %c0_2] : memref<1x768xf32, #tpu.memory_space<vmem>>, vector<1x768xf32>
    %cst = arith.constant 0.000000e+00 : f32
    %2 = vector.broadcast %cst : f32 to vector<8x128xf32>
    %c0_3 = arith.constant 0 : index
    %c0_4 = arith.constant 0 : index
    %3 = vector.load %arg10[%c0_3, %c0_4] : memref<8x1024xf32, #tpu.memory_space<vmem>>, vector<8x128xf32>
    tpu.vector_store %arg10[%c0_3, %c0_4], %2 {strides = array<i32>} : memref<8x1024xf32, #tpu.memory_space<vmem>>, vector<8x128xf32>,
    %c0_5 = arith.constant 0 : index
    %c896 = arith.constant 896 : index
    %4 = vector.load %arg10[%c0_5, %c896] : memref<8x1024xf32, #tpu.memory_space<vmem>>, vector<8x128xf32>
    tpu.vector_store %arg10[%c0_5, %c896], %2 {strides = array<i32>} : memref<8x1024xf32, #tpu.memory_space<vmem>>, vector<8x128xf32>,
    %cst_6 = arith.constant 0.000000e+00 : f32
    %5 = vector.broadcast %cst_6 : f32 to vector<4x768xf32>
    %6 = arith.maximumf %0, %5 : vector<4x768xf32>
    %c0_7 = arith.constant 0 : index
    %c128 = arith.constant 128 : index
    %7 = vector.load %arg10[%c0_7, %c128] : memref<8x1024xf32, #tpu.memory_space<vmem>>, vector<4x768xf32>
    tpu.vector_store %arg10[%c0_7, %c128], %6 {strides = array<i32>} : memref<8x1024xf32, #tpu.memory_space<vmem>>, vector<4x768xf32>,
    %c0_8 = arith.constant 0 : index
    %c109 = arith.constant 109 : index
    %8 = vector.load %arg10[%c0_8, %c109] : memref<8x1024xf32, #tpu.memory_space<vmem>>, vector<4x768xf32>
    %c0_9 = arith.constant 0 : index
    %c0_10 = arith.constant 0 : index
    %c0_11 = arith.constant 0 : index
    %9 = vector.load %arg2[%c0_9, %c0_10, %c0_11] : memref<9x8x4xf32, #tpu.memory_space<vmem>>, vector<1x8x4xf32>
    %10 = vector.shape_cast %9 : vector<1x8x4xf32> to vector<8x4xf32>
    %cst_12 = arith.constant dense<0.000000e+00> : vector<8x768xf32>
    %11 = tpu.matmul %10, %8, %cst_12 {dimension_numbers = #tpu.dot_dimension_numbers<[1], [0], [0], [1], [0, 0, 1, 1], [], []>} : vector<8x4xf32>, vector<4x768xf32>, vector<8x768xf32> -> vector<8x768xf32>
    %c0_13 = arith.constant 0 : index
    %c110 = arith.constant 110 : index
    %12 = vector.load %arg10[%c0_13, %c110] : memref<8x1024xf32, #tpu.memory_space<vmem>>, vector<4x768xf32>
    %c1 = arith.constant 1 : index
    %c0_14 = arith.constant 0 : index
    %c0_15 = arith.constant 0 : index
    %13 = vector.load %arg2[%c1, %c0_14, %c0_15] : memref<9x8x4xf32, #tpu.memory_space<vmem>>, vector<1x8x4xf32>
    %14 = vector.shape_cast %13 : vector<1x8x4xf32> to vector<8x4xf32>
    %cst_16 = arith.constant dense<0.000000e+00> : vector<8x768xf32>
    %15 = tpu.matmul %14, %12, %cst_16 {dimension_numbers = #tpu.dot_dimension_numbers<[1], [0], [0], [1], [0, 0, 1, 1], [], []>} : vector<8x4xf32>, vector<4x768xf32>, vector<8x768xf32> -> vector<8x768xf32>
    %16 = arith.addf %11, %15 : vector<8x768xf32>
    %c0_17 = arith.constant 0 : index
    %c111 = arith.constant 111 : index
    %17 = vector.load %arg10[%c0_17, %c111] : memref<8x1024xf32, #tpu.memory_space<vmem>>, vector<4x768xf32>
    %c2 = arith.constant 2 : index
    %c0_18 = arith.constant 0 : index
    %c0_19 = arith.constant 0 : index
    %18 = vector.load %arg2[%c2, %c0_18, %c0_19] : memref<9x8x4xf32, #tpu.memory_space<vmem>>, vector<1x8x4xf32>
    %19 = vector.shape_cast %18 : vector<1x8x4xf32> to vector<8x4xf32>
    %cst_20 = arith.constant dense<0.000000e+00> : vector<8x768xf32>
    %20 = tpu.matmul %19, %17, %cst_20 {dimension_numbers = #tpu.dot_dimension_numbers<[1], [0], [0], [1], [0, 0, 1, 1], [], []>} : vector<8x4xf32>, vector<4x768xf32>, vector<8x768xf32> -> vector<8x768xf32>
    %21 = arith.addf %16, %20 : vector<8x768xf32>
    %c0_21 = arith.constant 0 : index
    %c127 = arith.constant 127 : index
    %22 = vector.load %arg10[%c0_21, %c127] : memref<8x1024xf32, #tpu.memory_space<vmem>>, vector<4x768xf32>
    %c3 = arith.constant 3 : index
    %c0_22 = arith.constant 0 : index
    %c0_23 = arith.constant 0 : index
    %23 = vector.load %arg2[%c3, %c0_22, %c0_23] : memref<9x8x4xf32, #tpu.memory_space<vmem>>, vector<1x8x4xf32>
    %24 = vector.shape_cast %23 : vector<1x8x4xf32> to vector<8x4xf32>
    %cst_24 = arith.constant dense<0.000000e+00> : vector<8x768xf32>
    %25 = tpu.matmul %24, %22, %cst_24 {dimension_numbers = #tpu.dot_dimension_numbers<[1], [0], [0], [1], [0, 0, 1, 1], [], []>} : vector<8x4xf32>, vector<4x768xf32>, vector<8x768xf32> -> vector<8x768xf32>
    %26 = arith.addf %21, %25 : vector<8x768xf32>
    %c0_25 = arith.constant 0 : index
    %c128_26 = arith.constant 128 : index
    %27 = vector.load %arg10[%c0_25, %c128_26] : memref<8x1024xf32, #tpu.memory_space<vmem>>, vector<4x768xf32>
    %c4 = arith.constant 4 : index
    %c0_27 = arith.constant 0 : index
    %c0_28 = arith.constant 0 : index
    %28 = vector.load %arg2[%c4, %c0_27, %c0_28] : memref<9x8x4xf32, #tpu.memory_space<vmem>>, vector<1x8x4xf32>
    %29 = vector.shape_cast %28 : vector<1x8x4xf32> to vector<8x4xf32>
    %cst_29 = arith.constant dense<0.000000e+00> : vector<8x768xf32>
    %30 = tpu.matmul %29, %27, %cst_29 {dimension_numbers = #tpu.dot_dimension_numbers<[1], [0], [0], [1], [0, 0, 1, 1], [], []>} : vector<8x4xf32>, vector<4x768xf32>, vector<8x768xf32> -> vector<8x768xf32>
    %31 = arith.addf %26, %30 : vector<8x768xf32>
    %c0_30 = arith.constant 0 : index
    %c129 = arith.constant 129 : index
    %32 = vector.load %arg10[%c0_30, %c129] : memref<8x1024xf32, #tpu.memory_space<vmem>>, vector<4x768xf32>
    %c5 = arith.constant 5 : index
    %c0_31 = arith.constant 0 : index
    %c0_32 = arith.constant 0 : index
    %33 = vector.load %arg2[%c5, %c0_31, %c0_32] : memref<9x8x4xf32, #tpu.memory_space<vmem>>, vector<1x8x4xf32>
    %34 = vector.shape_cast %33 : vector<1x8x4xf32> to vector<8x4xf32>
    %cst_33 = arith.constant dense<0.000000e+00> : vector<8x768xf32>
    %35 = tpu.matmul %34, %32, %cst_33 {dimension_numbers = #tpu.dot_dimension_numbers<[1], [0], [0], [1], [0, 0, 1, 1], [], []>} : vector<8x4xf32>, vector<4x768xf32>, vector<8x768xf32> -> vector<8x768xf32>
    %36 = arith.addf %31, %35 : vector<8x768xf32>
    %c0_34 = arith.constant 0 : index
    %c145 = arith.constant 145 : index
    %37 = vector.load %arg10[%c0_34, %c145] : memref<8x1024xf32, #tpu.memory_space<vmem>>, vector<4x768xf32>
    %c6 = arith.constant 6 : index
    %c0_35 = arith.constant 0 : index
    %c0_36 = arith.constant 0 : index
    %38 = vector.load %arg2[%c6, %c0_35, %c0_36] : memref<9x8x4xf32, #tpu.memory_space<vmem>>, vector<1x8x4xf32>
    %39 = vector.shape_cast %38 : vector<1x8x4xf32> to vector<8x4xf32>
    %cst_37 = arith.constant dense<0.000000e+00> : vector<8x768xf32>
    %40 = tpu.matmul %39, %37, %cst_37 {dimension_numbers = #tpu.dot_dimension_numbers<[1], [0], [0], [1], [0, 0, 1, 1], [], []>} : vector<8x4xf32>, vector<4x768xf32>, vector<8x768xf32> -> vector<8x768xf32>
    %41 = arith.addf %36, %40 : vector<8x768xf32>
    %c0_38 = arith.constant 0 : index
    %c146 = arith.constant 146 : index
    %42 = vector.load %arg10[%c0_38, %c146] : memref<8x1024xf32, #tpu.memory_space<vmem>>, vector<4x768xf32>
    %c7 = arith.constant 7 : index
    %c0_39 = arith.constant 0 : index
    %c0_40 = arith.constant 0 : index
    %43 = vector.load %arg2[%c7, %c0_39, %c0_40] : memref<9x8x4xf32, #tpu.memory_space<vmem>>, vector<1x8x4xf32>
    %44 = vector.shape_cast %43 : vector<1x8x4xf32> to vector<8x4xf32>
    %cst_41 = arith.constant dense<0.000000e+00> : vector<8x768xf32>
    %45 = tpu.matmul %44, %42, %cst_41 {dimension_numbers = #tpu.dot_dimension_numbers<[1], [0], [0], [1], [0, 0, 1, 1], [], []>} : vector<8x4xf32>, vector<4x768xf32>, vector<8x768xf32> -> vector<8x768xf32>
    %46 = arith.addf %41, %45 : vector<8x768xf32>
    %c0_42 = arith.constant 0 : index
    %c147 = arith.constant 147 : index
    %47 = vector.load %arg10[%c0_42, %c147] : memref<8x1024xf32, #tpu.memory_space<vmem>>, vector<4x768xf32>
    %c8 = arith.constant 8 : index
    %c0_43 = arith.constant 0 : index
    %c0_44 = arith.constant 0 : index
    %48 = vector.load %arg2[%c8, %c0_43, %c0_44] : memref<9x8x4xf32, #tpu.memory_space<vmem>>, vector<1x8x4xf32>
    %49 = vector.shape_cast %48 : vector<1x8x4xf32> to vector<8x4xf32>
    %cst_45 = arith.constant dense<0.000000e+00> : vector<8x768xf32>
    %50 = tpu.matmul %49, %47, %cst_45 {dimension_numbers = #tpu.dot_dimension_numbers<[1], [0], [0], [1], [0, 0, 1, 1], [], []>} : vector<8x4xf32>, vector<4x768xf32>, vector<8x768xf32> -> vector<8x768xf32>
    %51 = arith.addf %46, %50 : vector<8x768xf32>
    %c0_46 = arith.constant 0 : index
    %c0_47 = arith.constant 0 : index
    %52 = vector.load %arg3[%c0_46, %c0_47] : memref<8x1xf32, #tpu.memory_space<vmem>>, vector<8x1xf32>
    %53 = vector.broadcast %52 : vector<8x1xf32> to vector<8x768xf32>
    %54 = arith.addf %51, %53 : vector<8x768xf32>
    %cst_48 = arith.constant 0.000000e+00 : f32
    %55 = vector.broadcast %cst_48 : f32 to vector<8x768xf32>
    %56 = arith.maximumf %54, %55 : vector<8x768xf32>
    %57 = vector.broadcast %1 : vector<1x768xf32> to vector<8x768xf32>
    %58 = arith.mulf %56, %57 : vector<8x768xf32>
    %c0_49 = arith.constant 0 : index
    %c128_50 = arith.constant 128 : index
    %59 = vector.load %arg10[%c0_49, %c128_50] : memref<8x1024xf32, #tpu.memory_space<vmem>>, vector<8x768xf32>
    tpu.vector_store %arg10[%c0_49, %c128_50], %58 {strides = array<i32>} : memref<8x1024xf32, #tpu.memory_space<vmem>>, vector<8x768xf32>,
    %c0_51 = arith.constant 0 : index
    %c109_52 = arith.constant 109 : index
    %60 = vector.load %arg10[%c0_51, %c109_52] : memref<8x1024xf32, #tpu.memory_space<vmem>>, vector<8x768xf32>
    %c0_53 = arith.constant 0 : index
    %c0_54 = arith.constant 0 : index
    %c0_55 = arith.constant 0 : index
    %61 = vector.load %arg4[%c0_53, %c0_54, %c0_55] : memref<9x8x8xf32, #tpu.memory_space<vmem>>, vector<1x8x8xf32>
    %62 = vector.shape_cast %61 : vector<1x8x8xf32> to vector<8x8xf32>
    %cst_56 = arith.constant dense<0.000000e+00> : vector<8x768xf32>
    %63 = tpu.matmul %62, %60, %cst_56 {dimension_numbers = #tpu.dot_dimension_numbers<[1], [0], [0], [1], [0, 0, 1, 1], [], []>} : vector<8x8xf32>, vector<8x768xf32>, vector<8x768xf32> -> vector<8x768xf32>
    %c0_57 = arith.constant 0 : index
    %c110_58 = arith.constant 110 : index
    %64 = vector.load %arg10[%c0_57, %c110_58] : memref<8x1024xf32, #tpu.memory_space<vmem>>, vector<8x768xf32>
    %c1_59 = arith.constant 1 : index
    %c0_60 = arith.constant 0 : index
    %c0_61 = arith.constant 0 : index
    %65 = vector.load %arg4[%c1_59, %c0_60, %c0_61] : memref<9x8x8xf32, #tpu.memory_space<vmem>>, vector<1x8x8xf32>
    %66 = vector.shape_cast %65 : vector<1x8x8xf32> to vector<8x8xf32>
    %cst_62 = arith.constant dense<0.000000e+00> : vector<8x768xf32>
    %67 = tpu.matmul %66, %64, %cst_62 {dimension_numbers = #tpu.dot_dimension_numbers<[1], [0], [0], [1], [0, 0, 1, 1], [], []>} : vector<8x8xf32>, vector<8x768xf32>, vector<8x768xf32> -> vector<8x768xf32>
    %68 = arith.addf %63, %67 : vector<8x768xf32>
    %c0_63 = arith.constant 0 : index
    %c111_64 = arith.constant 111 : index
    %69 = vector.load %arg10[%c0_63, %c111_64] : memref<8x1024xf32, #tpu.memory_space<vmem>>, vector<8x768xf32>
    %c2_65 = arith.constant 2 : index
    %c0_66 = arith.constant 0 : index
    %c0_67 = arith.constant 0 : index
    %70 = vector.load %arg4[%c2_65, %c0_66, %c0_67] : memref<9x8x8xf32, #tpu.memory_space<vmem>>, vector<1x8x8xf32>
    %71 = vector.shape_cast %70 : vector<1x8x8xf32> to vector<8x8xf32>
    %cst_68 = arith.constant dense<0.000000e+00> : vector<8x768xf32>
    %72 = tpu.matmul %71, %69, %cst_68 {dimension_numbers = #tpu.dot_dimension_numbers<[1], [0], [0], [1], [0, 0, 1, 1], [], []>} : vector<8x8xf32>, vector<8x768xf32>, vector<8x768xf32> -> vector<8x768xf32>
    %73 = arith.addf %68, %72 : vector<8x768xf32>
    %c0_69 = arith.constant 0 : index
    %c127_70 = arith.constant 127 : index
    %74 = vector.load %arg10[%c0_69, %c127_70] : memref<8x1024xf32, #tpu.memory_space<vmem>>, vector<8x768xf32>
    %c3_71 = arith.constant 3 : index
    %c0_72 = arith.constant 0 : index
    %c0_73 = arith.constant 0 : index
    %75 = vector.load %arg4[%c3_71, %c0_72, %c0_73] : memref<9x8x8xf32, #tpu.memory_space<vmem>>, vector<1x8x8xf32>
    %76 = vector.shape_cast %75 : vector<1x8x8xf32> to vector<8x8xf32>
    %cst_74 = arith.constant dense<0.000000e+00> : vector<8x768xf32>
    %77 = tpu.matmul %76, %74, %cst_74 {dimension_numbers = #tpu.dot_dimension_numbers<[1], [0], [0], [1], [0, 0, 1, 1], [], []>} : vector<8x8xf32>, vector<8x768xf32>, vector<8x768xf32> -> vector<8x768xf32>
    %78 = arith.addf %73, %77 : vector<8x768xf32>
    %c0_75 = arith.constant 0 : index
    %c128_76 = arith.constant 128 : index
    %79 = vector.load %arg10[%c0_75, %c128_76] : memref<8x1024xf32, #tpu.memory_space<vmem>>, vector<8x768xf32>
    %c4_77 = arith.constant 4 : index
    %c0_78 = arith.constant 0 : index
    %c0_79 = arith.constant 0 : index
    %80 = vector.load %arg4[%c4_77, %c0_78, %c0_79] : memref<9x8x8xf32, #tpu.memory_space<vmem>>, vector<1x8x8xf32>
    %81 = vector.shape_cast %80 : vector<1x8x8xf32> to vector<8x8xf32>
    %cst_80 = arith.constant dense<0.000000e+00> : vector<8x768xf32>
    %82 = tpu.matmul %81, %79, %cst_80 {dimension_numbers = #tpu.dot_dimension_numbers<[1], [0], [0], [1], [0, 0, 1, 1], [], []>} : vector<8x8xf32>, vector<8x768xf32>, vector<8x768xf32> -> vector<8x768xf32>
    %83 = arith.addf %78, %82 : vector<8x768xf32>
    %c0_81 = arith.constant 0 : index
    %c129_82 = arith.constant 129 : index
    %84 = vector.load %arg10[%c0_81, %c129_82] : memref<8x1024xf32, #tpu.memory_space<vmem>>, vector<8x768xf32>
    %c5_83 = arith.constant 5 : index
    %c0_84 = arith.constant 0 : index
    %c0_85 = arith.constant 0 : index
    %85 = vector.load %arg4[%c5_83, %c0_84, %c0_85] : memref<9x8x8xf32, #tpu.memory_space<vmem>>, vector<1x8x8xf32>
    %86 = vector.shape_cast %85 : vector<1x8x8xf32> to vector<8x8xf32>
    %cst_86 = arith.constant dense<0.000000e+00> : vector<8x768xf32>
    %87 = tpu.matmul %86, %84, %cst_86 {dimension_numbers = #tpu.dot_dimension_numbers<[1], [0], [0], [1], [0, 0, 1, 1], [], []>} : vector<8x8xf32>, vector<8x768xf32>, vector<8x768xf32> -> vector<8x768xf32>
    %88 = arith.addf %83, %87 : vector<8x768xf32>
    %c0_87 = arith.constant 0 : index
    %c145_88 = arith.constant 145 : index
    %89 = vector.load %arg10[%c0_87, %c145_88] : memref<8x1024xf32, #tpu.memory_space<vmem>>, vector<8x768xf32>
    %c6_89 = arith.constant 6 : index
    %c0_90 = arith.constant 0 : index
    %c0_91 = arith.constant 0 : index
    %90 = vector.load %arg4[%c6_89, %c0_90, %c0_91] : memref<9x8x8xf32, #tpu.memory_space<vmem>>, vector<1x8x8xf32>
    %91 = vector.shape_cast %90 : vector<1x8x8xf32> to vector<8x8xf32>
    %cst_92 = arith.constant dense<0.000000e+00> : vector<8x768xf32>
    %92 = tpu.matmul %91, %89, %cst_92 {dimension_numbers = #tpu.dot_dimension_numbers<[1], [0], [0], [1], [0, 0, 1, 1], [], []>} : vector<8x8xf32>, vector<8x768xf32>, vector<8x768xf32> -> vector<8x768xf32>
    %93 = arith.addf %88, %92 : vector<8x768xf32>
    %c0_93 = arith.constant 0 : index
    %c146_94 = arith.constant 146 : index
    %94 = vector.load %arg10[%c0_93, %c146_94] : memref<8x1024xf32, #tpu.memory_space<vmem>>, vector<8x768xf32>
    %c7_95 = arith.constant 7 : index
    %c0_96 = arith.constant 0 : index
    %c0_97 = arith.constant 0 : index
    %95 = vector.load %arg4[%c7_95, %c0_96, %c0_97] : memref<9x8x8xf32, #tpu.memory_space<vmem>>, vector<1x8x8xf32>
    %96 = vector.shape_cast %95 : vector<1x8x8xf32> to vector<8x8xf32>
    %cst_98 = arith.constant dense<0.000000e+00> : vector<8x768xf32>
    %97 = tpu.matmul %96, %94, %cst_98 {dimension_numbers = #tpu.dot_dimension_numbers<[1], [0], [0], [1], [0, 0, 1, 1], [], []>} : vector<8x8xf32>, vector<8x768xf32>, vector<8x768xf32> -> vector<8x768xf32>
    %98 = arith.addf %93, %97 : vector<8x768xf32>
    %c0_99 = arith.constant 0 : index
    %c147_100 = arith.constant 147 : index
    %99 = vector.load %arg10[%c0_99, %c147_100] : memref<8x1024xf32, #tpu.memory_space<vmem>>, vector<8x768xf32>
    %c8_101 = arith.constant 8 : index
    %c0_102 = arith.constant 0 : index
    %c0_103 = arith.constant 0 : index
    %100 = vector.load %arg4[%c8_101, %c0_102, %c0_103] : memref<9x8x8xf32, #tpu.memory_space<vmem>>, vector<1x8x8xf32>
    %101 = vector.shape_cast %100 : vector<1x8x8xf32> to vector<8x8xf32>
    %cst_104 = arith.constant dense<0.000000e+00> : vector<8x768xf32>
    %102 = tpu.matmul %101, %99, %cst_104 {dimension_numbers = #tpu.dot_dimension_numbers<[1], [0], [0], [1], [0, 0, 1, 1], [], []>} : vector<8x8xf32>, vector<8x768xf32>, vector<8x768xf32> -> vector<8x768xf32>
    %103 = arith.addf %98, %102 : vector<8x768xf32>
    %c0_105 = arith.constant 0 : index
    %c0_106 = arith.constant 0 : index
    %104 = vector.load %arg5[%c0_105, %c0_106] : memref<8x1xf32, #tpu.memory_space<vmem>>, vector<8x1xf32>
    %105 = vector.broadcast %104 : vector<8x1xf32> to vector<8x768xf32>
    %106 = arith.addf %103, %105 : vector<8x768xf32>
    %c0_107 = arith.constant 0 : index
    %c0_108 = arith.constant 0 : index
    %107 = vector.load %arg6[%c0_107, %c0_108] : memref<8x4xf32, #tpu.memory_space<vmem>>, vector<8x4xf32>
    %cst_109 = arith.constant dense<0.000000e+00> : vector<8x768xf32>
    %108 = tpu.matmul %107, %0, %cst_109 {dimension_numbers = #tpu.dot_dimension_numbers<[1], [0], [0], [1], [0, 0, 1, 1], [], []>} : vector<8x4xf32>, vector<4x768xf32>, vector<8x768xf32> -> vector<8x768xf32>
    %c0_110 = arith.constant 0 : index
    %c0_111 = arith.constant 0 : index
    %109 = vector.load %arg7[%c0_110, %c0_111] : memref<8x1xf32, #tpu.memory_space<vmem>>, vector<8x1xf32>
    %110 = vector.broadcast %109 : vector<8x1xf32> to vector<8x768xf32>
    %111 = arith.addf %108, %110 : vector<8x768xf32>
    %112 = arith.addf %106, %111 : vector<8x768xf32>
    %c0_112 = arith.constant 0 : index
    %c0_113 = arith.constant 0 : index
    %113 = vector.load %arg9[%c0_112, %c0_113] : memref<8x768xf32, #tpu.memory_space<vmem>>, vector<8x768xf32>
    tpu.vector_store %arg9[%c0_112, %c0_113], %112 {strides = array<i32>} : memref<8x768xf32, #tpu.memory_space<vmem>>, vector<8x768xf32>,
    return
  }
  func.func @transform_0(%arg0: i32) -> (i32, i32) {
    %c0_i32 = arith.constant 0 : i32
    %c0_i32_0 = arith.constant 0 : i32
    return %c0_i32, %arg0 : i32, i32
  }
  func.func @transform_1(%arg0: i32) -> (i32, i32, i32) {
    %c0_i32 = arith.constant 0 : i32
    %c0_i32_0 = arith.constant 0 : i32
    %c0_i32_1 = arith.constant 0 : i32
    %c0_i32_2 = arith.constant 0 : i32
    return %c0_i32, %c0_i32_0, %c0_i32_1 : i32, i32, i32
  }
  func.func @transform_2(%arg0: i32) -> (i32, i32) {
    %c0_i32 = arith.constant 0 : i32
    %c0_i32_0 = arith.constant 0 : i32
    %c0_i32_1 = arith.constant 0 : i32
    return %c0_i32, %c0_i32_0 : i32, i32
  }
  func.func @transform_3(%arg0: i32) -> (i32, i32, i32) {
    %c0_i32 = arith.constant 0 : i32
    %c0_i32_0 = arith.constant 0 : i32
    %c0_i32_1 = arith.constant 0 : i32
    %c0_i32_2 = arith.constant 0 : i32
    return %c0_i32, %c0_i32_0, %c0_i32_1 : i32, i32, i32
  }
  func.func @transform_4(%arg0: i32) -> (i32, i32) {
    %c0_i32 = arith.constant 0 : i32
    %c0_i32_0 = arith.constant 0 : i32
    %c0_i32_1 = arith.constant 0 : i32
    return %c0_i32, %c0_i32_0 : i32, i32
  }
  func.func @transform_5(%arg0: i32) -> (i32, i32) {
    %c0_i32 = arith.constant 0 : i32
    %c0_i32_0 = arith.constant 0 : i32
    %c0_i32_1 = arith.constant 0 : i32
    return %c0_i32, %c0_i32_0 : i32, i32
  }
  func.func @transform_6(%arg0: i32) -> (i32, i32) {
    %c0_i32 = arith.constant 0 : i32
    %c0_i32_0 = arith.constant 0 : i32
    %c0_i32_1 = arith.constant 0 : i32
    return %c0_i32, %c0_i32_0 : i32, i32
  }
  func.func @transform_7(%arg0: i32) -> (i32, i32) {
    %c0_i32 = arith.constant 0 : i32
    %c0_i32_0 = arith.constant 0 : i32
    %c0_i32_1 = arith.constant 0 : i32
    return %c0_i32, %c0_i32_0 : i32, i32
  }
  func.func @transform_8(%arg0: i32) -> (i32, i32) {
    %c0_i32 = arith.constant 0 : i32
    %c0_i32_0 = arith.constant 0 : i32
    return %c0_i32, %arg0 : i32, i32
  }
}

</mosaic_0001>

<bundles_post_ra>
// kernel: tpu_custom_call.1
= control target key start
LH: loop header
LB: loop body
LE: loop exit
PB: predicated region body
PF: predicated region fallthrough
CT: control target
= control target key end

     0   :  { %13 = vsyncpa [#allocation4], 0  ;;  %s6412_s0 = inlined_call_operand.vmem [shape: f32[4,1536], index: 0, kind: input, shape index: {}]   ;;  %s6413_s1 = inlined_call_operand.vmem [shape: f32[9,8,4], index: 1, kind: input, shape index: {}]   ;;  %s6414_s2 = inlined_call_operand.vmem [shape: f32[8,1], index: 2, kind: input, shape index: {}]   ;;  %s6415_s3 = inlined_call_operand.vmem [shape: f32[9,8,8], index: 3, kind: input, shape index: {}]   ;;  %s6416_s4 = inlined_call_operand.vmem [shape: f32[8,1], index: 4, kind: input, shape index: {}]   ;;  %s6417_s5 = inlined_call_operand.vmem [shape: f32[8,4], index: 5, kind: input, shape index: {}]   ;;  %s6418_s6 = inlined_call_operand.vmem [shape: f32[8,1], index: 6, kind: input, shape index: {}]   ;;  %s6419_s7 = inlined_call_operand.vmem [shape: f32[1,768], index: 7, kind: input, shape index: {}]   ;;  %s6420_s8 = inlined_call_operand.hbm [shape: f32[8,1536], index: 8, kind: output, shape index: {}]  }
   0x1   :  { %15 = vsyncpa [#allocation4 + $0x1], 0  ;;  %s5715_s27 = smov 0   ;;  %s5717_s28 = smov 0  }
   0x2   :  { %s5719_s29 = smov 0   ;;  %s5721_s30 = smov 0  }
   0x3 LB: > { %s5736_s9 = sadd.s32 4294967295, %s5657_s30   ;;  %s5280_s10 = sadd.s32 4294967294, %s5657_s30   ;;  %s5657_s30 = sphi %s5721_s30, %s6426_s30   ;;  %s5653_s29 = sphi %s5719_s29, %s6425_s29   ;;  %s5649_s28 = sphi %s5717_s28, %s6424_s28   ;;  %s5645_s27 = sphi %s5715_s27, %s6423_s27  }
   0x4   : > { %s5740_s11 = sadd.s32 1, %s5657_s30   ;;  %s201_s12 = sadd.s32 1, %s5653_s29 }
   0x5   : > { %s198_s13 = ssub.s32 %s5657_s30, %s5740_s11  ;;  %p211_p0 = scmp.ne.s32.totalorder %s5653_s29, %s5649_s28 }
   0x6   : > { %p199_p1 = scmp.eq.s32.totalorder %s198_s13, 0  ;;  %p212_p2 = scmp.eq.s32.totalorder %s5736_s9, 1 }
   0x7   : > { %p217_p3 = scmp.ne.s32.totalorder %s5649_s28, %s5645_s27  ;;  %p218_p4 = scmp.eq.s32.totalorder %s5280_s10, 1 }
   0x8   : > { %s5751_s14 = scalar_select %p199_p1, %s5653_s29, %s201_s12  }
   0x9   : > { %p5753_p5 = por %p212_p2, %p211_p0  ;;  %p5757_p6 = por %p218_p4, %p217_p3 }
   0xa   : > { %p5283_p7 = scmp.ge.s32.totalorder %s5657_s30, 1  ;;  %p266_p8 = scmp.lt.s32.totalorder %s5657_s30, 3 }
   0xc   : > { %p267_p9 = pnand %p5283_p7, %p266_p8 }
   0xd   : > { %v5659_v0 = vmov (!%p267_p9), 0.0   ;;  %s300_s17 = smul.u32 (!%p267_p9), 6, %s5736_s9  ;;  %s5660_s22 = smov (!%p267_p9), 18   ;;  %v5668_v25 = vmov (!%p267_p9), 0   ;;  %v2640_v27 = vld [vmem:[%s6414_s2] sm:$0xff] (!%p267_p9)  ;;  %vm362_vm0 = vcmask (!%p267_p9), 146432  }
   0xe   : > { %270 = sbr.rel (%p267_p9) target bundleno = 942 (0x3ae), region = 52  ;;  %311 = vst [vmem:[#allocation2] sm:$0xff] (!%p267_p9), %v5659_v0  ;;  %312 = vst [vmem:[#allocation2 + $0x38] sm:$0xff] (!%p267_p9), %v5659_v0  ;;  %450 = vmatprep.mubr.f32.mxu0 (!%p267_p9), %v5659_v0  ;;  %2883 = vmatprep.mubr.f32.mxu1 (!%p267_p9), %v5659_v0  ;;  %s5661_s23 = smov (!%p267_p9), 19   ;;  %vm373_vm1 = vcmask (!%p267_p9), 1043456   ;;  %v5285_v35 = vld [vmem:[%s6413_s1 + $0x8] sm:$0xff] (!%p267_p9) }
   0xf   : > { %p301_p10 = scmp.lt.s32.totalorder (!%p267_p9), %s300_s17, 11  ;;  %s5662_s24 = smov (!%p267_p9), 17   ;;  %5586 = vset.pattern.permute.xlu0 (!%p267_p9), %v5668_v25  ;;  %5587 = vset.pattern.permute.xlu1 (!%p267_p9), %v5668_v25  ;;  %vm369_vm2 = vcmask (!%p267_p9), 31744   ;;  %vm613_vm3 = vcmask (!%p267_p9), 154624   ;;  %v338_v48 = vld [vmem:[%s6413_s1] sm:$0xff] (!%p267_p9)  ;;  %vm864_vm4 = vcmask (!%p267_p9), 138240  }
  0x10   : > { %s5663_s25 = smov (!%p267_p9), 1   ;;  %s5664_s26 = smov (!%p267_p9), 127   ;;  %v5304_v62 = vld [vmem:[%s6413_s1 + $0x10] sm:$0xff] (!%p267_p9)  ;;  %vm1121_vm5 = vcmask (!%p267_p9), 7168   ;;  %vm1628_vm6 = vcmask (!%p267_p9), 1039360   ;;  %vm1885_vm7 = vcmask (!%p267_p9), 908288  }
  0x11   : > { %s5665_s10 = smov (!%p267_p9), 111   ;;  %s5666_s12 = smov (!%p267_p9), 110   ;;  %vm2142_vm8 = vcmask (!%p267_p9), 900096   ;;  %vm2399_vm9 = vcmask (!%p267_p9), 891904   ;;  %vm2744_vm10 = vcmask (!%p267_p9), 64512  }
  0x12   : > { %s5667_s13 = smov (!%p267_p9), 109   ;;  %s5669_s19 = smov (!%p267_p9), [#allocation3]  }
  0x13   : > { %s5599_s20 = sshll.u32 (!%p267_p9), %s5669_s19, 4  ;;  %s5600_s20 = int_to_ptr.vmem [resolvable:$false] %s5599_s20 }
  0x15   : > { %s6428_s17 = smov (!%p301_p10, %s300_s17), 11  ;;  %v331_v1 = vld [vmem:[#allocation2] sm:$0xf]  ;;  %v1604_v23 = vld [vmem:[#allocation2 + $0x38] sm:$0xf] }
  0x16   : > { %s5284_s18 = sshll.u32 %s6428_s17, 2  ;;  %348 = vrot.lane.b32.xlu1 %v331_v1, %s5660_s22  ;;  %s5601_s17 = scalar_lea.vmem %s5600_s20, 1536 }
  0x17   : > { %s5771_s21 = scalar_lea.vmem %s6412_s0, %s5284_s18 }
  0x18   : > { %v308_v2 = vld [vmem:[%s5771_s21 + $0x8] sm:$0xff]  ;;  %v307_v3 = vld [vmem:[%s5771_s21] sm:$0xff]  ;;  %v309_v4 = vld [vmem:[%s5771_s21 + $0x10] sm:$0xff] }
  0x19   : > { %v314_v5 = vmax.f32 %v308_v2, 0.0  ;;  %v313_v6 = vmax.f32 %v307_v3, 0.0  ;;  %v315_v7 = vmax.f32 %v309_v4, 0.0 }
  0x1a   : > { %599 = vrot.lane.b32.xlu1 %v331_v1, %s5661_s23 }
  0x1b   : > { %327 = vst [vmem:[#allocation2 + $0x18] sm:$0xf] %v314_v5  ;;  %325 = vst [vmem:[#allocation2 + $0x8] sm:$0xf] %v313_v6  ;;  %v319_v8 = vcombine.high %v313_v6, %v313_v6  ;;  %v320_v9 = vcombine.high %v314_v5, %v314_v5  ;;  %v321_v10 = vcombine.high %v315_v7, %v315_v7 }
  0x1c   : > { %329 = vst [vmem:[#allocation2 + $0x28] sm:$0xf] %v315_v7 }
  0x1d   : > { %326 = vst [vmem:[#allocation2 + $0x10] sm:$0xf] %v319_v8  ;;  %328 = vst [vmem:[#allocation2 + $0x20] sm:$0xf] %v320_v9 }
  0x1e   : > { %330 = vst [vmem:[#allocation2 + $0x30] sm:$0xf] %v321_v10 }
  0x22   : > { %v5778_v11 = vld [vmem:[#allocation2 + $0x18] sm:$0xf]  ;;  %v5780_v12 = vld [vmem:[#allocation2 + $0x8] sm:$0xf] }
  0x23   : > { %354 = vrot.lane.b32.xlu1 %v5778_v11, %s5660_s22  ;;  %350 = vrot.lane.b32.xlu0 %v5780_v12, %s5660_s22  ;;  %v5786_v13 = vld [vmem:[#allocation2 + $0x28] sm:$0xf]  ;;  %v1600_v17 = vld [vmem:[#allocation2 + $0x18] sm:$0xf] }
  0x24   : > { %v5792_v14 = vld [vmem:[#allocation2 + $0x10] sm:$0xf]  ;;  %v5798_v15 = vld [vmem:[#allocation2 + $0x20] sm:$0xf]  ;;  %v1598_v21 = vld [vmem:[#allocation2 + $0x8] sm:$0xf] }
  0x25   : > { %v5804_v16 = vld [vmem:[#allocation2 + $0x30] sm:$0xf]  ;;  %v1601_v18 = vld [vmem:[#allocation2 + $0x20] sm:$0xf]  ;;  %v1602_v22 = vld [vmem:[#allocation2 + $0x28] sm:$0xf] }
  0x26   : > { %v1599_v19 = vld [vmem:[#allocation2 + $0x10] sm:$0xf] }
  0x27   : > { %358 = vrot.lane.b32.xlu1 %v5786_v13, %s5660_s22  ;;  %605 = vrot.lane.b32.xlu0 %v5778_v11, %s5661_s23  ;;  %v1603_v20 = vld [vmem:[#allocation2 + $0x30] sm:$0xf] }
  0x2b   : > { %601 = vrot.lane.b32.xlu1 %v5780_v12, %s5661_s23  ;;  %352 = vrot.lane.b32.xlu0 %v5792_v14, %s5660_s22 }
  0x2f   : > { %607 = vrot.lane.b32.xlu1 %v5798_v15, %s5661_s23  ;;  %356 = vrot.lane.b32.xlu0 %v5798_v15, %s5660_s22 }
  0x33   : > { %360 = vrot.lane.b32.xlu0 %v5804_v16, %s5660_s22  ;;  %611 = vrot.lane.b32.xlu1 %v5804_v16, %s5661_s23 }
  0x37   : > { %603 = vrot.lane.b32.xlu0 %v5792_v14, %s5661_s23  ;;  %854 = vrot.lane.b32.xlu1 %v5792_v14, %s5662_s24 }
  0x3b   : > { %609 = vrot.lane.b32.xlu0 %v5786_v13, %s5661_s23  ;;  %856 = vrot.lane.b32.xlu1 %v5778_v11, %s5662_s24 }
  0x3f   : > { %852 = vrot.lane.b32.xlu0 %v5780_v12, %s5662_s24  ;;  %860 = vrot.lane.b32.xlu1 %v5786_v13, %s5662_s24 }
  0x43   : > { %850 = vrot.lane.b32.xlu0 %v331_v1, %s5662_s24  ;;  %1109 = vrot.lane.b32.xlu1 %v5780_v12, %s5663_s25 }
  0x47   : > { %858 = vrot.lane.b32.xlu0 %v5798_v15, %s5662_s24  ;;  %1107 = vrot.lane.b32.xlu1 %v331_v1, %s5663_s25 }
  0x4b   : > { %862 = vrot.lane.b32.xlu0 %v5804_v16, %s5662_s24  ;;  %1115 = vrot.lane.b32.xlu1 %v5798_v15, %s5663_s25 }
  0x4f   : > { %1111 = vrot.lane.b32.xlu0 %v5792_v14, %s5663_s25  ;;  %1119 = vrot.lane.b32.xlu1 %v5804_v16, %s5663_s25 }
  0x53   : > { %1113 = vrot.lane.b32.xlu0 %v5778_v11, %s5663_s25  ;;  %1618 = vrot.lane.b32.xlu1 %v1600_v17, %s5664_s26 }
  0x57   : > { %1117 = vrot.lane.b32.xlu0 %v5786_v13, %s5663_s25  ;;  %1620 = vrot.lane.b32.xlu1 %v1601_v18, %s5664_s26 }
  0x5b   : > { %1616 = vrot.lane.b32.xlu0 %v1599_v19, %s5664_s26  ;;  %1624 = vrot.lane.b32.xlu1 %v1603_v20, %s5664_s26 }
  0x5f   : > { %1614 = vrot.lane.b32.xlu0 %v1598_v21, %s5664_s26  ;;  %1873 = vrot.lane.b32.xlu1 %v1599_v19, %s5665_s10 }
  0x63   : > { %1622 = vrot.lane.b32.xlu0 %v1602_v22, %s5664_s26  ;;  %1871 = vrot.lane.b32.xlu1 %v1598_v21, %s5665_s10 }
  0x67   : > { %1626 = vrot.lane.b32.xlu0 %v1604_v23, %s5664_s26  ;;  %1879 = vrot.lane.b32.xlu1 %v1602_v22, %s5665_s10 }
  0x6b   : > { %1875 = vrot.lane.b32.xlu0 %v1600_v17, %s5665_s10  ;;  %1883 = vrot.lane.b32.xlu1 %v1604_v23, %s5665_s10 }
  0x6f   : > { %1877 = vrot.lane.b32.xlu0 %v1601_v18, %s5665_s10  ;;  %2132 = vrot.lane.b32.xlu1 %v1600_v17, %s5666_s12 }
  0x73   : > { %1881 = vrot.lane.b32.xlu0 %v1603_v20, %s5665_s10  ;;  %2134 = vrot.lane.b32.xlu1 %v1601_v18, %s5666_s12 }
  0x77   : > { %2130 = vrot.lane.b32.xlu0 %v1599_v19, %s5666_s12  ;;  %2138 = vrot.lane.b32.xlu1 %v1603_v20, %s5666_s12 }
  0x7b   : > { %2128 = vrot.lane.b32.xlu0 %v1598_v21, %s5666_s12  ;;  %2387 = vrot.lane.b32.xlu1 %v1599_v19, %s5667_s13 }
  0x7f   : > { %2136 = vrot.lane.b32.xlu0 %v1602_v22, %s5666_s12  ;;  %2385 = vrot.lane.b32.xlu1 %v1598_v21, %s5667_s13 }
  0x83   : > { %2140 = vrot.lane.b32.xlu0 %v1604_v23, %s5666_s12  ;;  %2393 = vrot.lane.b32.xlu1 %v1602_v22, %s5667_s13 }
  0x87   : > { %2389 = vrot.lane.b32.xlu0 %v1600_v17, %s5667_s13  ;;  %2397 = vrot.lane.b32.xlu1 %v1604_v23, %s5667_s13  ;;  %v5314_v17 = vld [vmem:[%s6413_s1 + $0x18] sm:$0xff] }
  0x88   : > { %v349_v24 = vpop.permute.xlu1 %348 }
  0x8b   : > { %2391 = vrot.lane.b32.xlu0 %v1601_v18, %s5667_s13  ;;  %2961 = vrot.lane.b32.xlu1 %v5659_v0, %s5661_s23 }
  0x8c   : > { %v600_v26 = vpop.permute.xlu1 %599 }
  0x8f   : > { %2395 = vrot.lane.b32.xlu0 %v1603_v20, %s5667_s13 }
  0x93   : > { %2643 = vperm.xlu0 %5586, %v2640_v27  }
  0x95   : > { %v355_v28 = vpop.permute.xlu1 %354  ;;  %v351_v29 = vpop.permute.xlu0 %350 }
  0x96   : > { %v363_v36 = vsel %vm362_vm0, %v349_v24, %v351_v29 }
  0x99   : > { %v359_v30 = vpop.permute.xlu1 %358  ;;  %v606_v31 = vpop.permute.xlu0 %605 }
  0x9d   : > { %v602_v32 = vpop.permute.xlu1 %601  ;;  %v353_v33 = vpop.permute.xlu0 %352 }
  0x9e   : > { %v364_v34 = vsel %vm362_vm0, %v351_v29, %v353_v33  ;;  %v365_v40 = vsel %vm362_vm0, %v353_v33, %v355_v28  ;;  %v614_v49 = vsel %vm613_vm3, %v600_v26, %v602_v32  ;;  %v5324_v29 = vld [vmem:[%s6413_s1 + $0x20] sm:$0xff] }
  0x9f   : > { %5286 = vmatprep.subr.msk.mxu0 %vm373_vm1, %v364_v34 }
  0xa0   : > { %5287 = vmatpush1.msk.msra.mxu0 %vm373_vm1, %v363_v36 }
  0xa1   : > { %v608_v37 = vpop.permute.xlu1 %607  ;;  %5288 = vmatmul.mubr.msk.f32.vlgmr.msra.gmra.mrb[0].mxu0 %vm369_vm2, %v5285_v35  ;;  %v357_v38 = vpop.permute.xlu0 %356 }
  0xa2   : > { %v366_v39 = vsel %vm362_vm0, %v355_v28, %v357_v38  ;;  %521 = vmatprep.mubr.f32.mxu0 %v5659_v0  ;;  %v367_v44 = vsel %vm362_vm0, %v357_v38, %v359_v30  ;;  %v617_v50 = vsel %vm613_vm3, %v606_v31, %v608_v37 }
  0xa3   : > { %5289 = vmatprep.subr.msk.mxu0 %vm373_vm1, %v366_v39 }
  0xa4   : > { %5290 = vmatpush1.msk.msra.mxu0 %vm373_vm1, %v365_v40 }
  0xa5   : > { %5291 = vmatmul.mubr.msk.f32.vlgmr.msra.gmra.mrb[2].mxu0 %vm369_vm2, %v5285_v35  ;;  %v361_v41 = vpop.permute.xlu0 %360  ;;  %v612_v42 = vpop.permute.xlu1 %611 }
  0xa6   : > { %v368_v43 = vsel %vm362_vm0, %v359_v30, %v361_v41  ;;  %592 = vmatprep.mubr.f32.mxu0 %v5659_v0 }
  0xa7   : > { %5292 = vmatprep.subr.msk.mxu0 %vm373_vm1, %v368_v43 }
  0xa8   : > { %5293 = vmatpush1.msk.msra.mxu0 %vm373_vm1, %v367_v44 }
  0xa9   : > { %5294 = vmatmul.mubr.msk.f32.vlgmr.msra.gmra.mrb[4].mxu0 %vm369_vm2, %v5285_v35  ;;  %v604_v45 = vpop.permute.xlu0 %603  ;;  %v855_v46 = vpop.permute.xlu1 %854 }
  0xaa   : > { %v615_v47 = vsel %vm613_vm3, %v602_v32, %v604_v45  ;;  %699 = vmatprep.mubr.f32.mxu0 %v5659_v0  ;;  %v616_v51 = vsel %vm613_vm3, %v604_v45, %v606_v31 }
  0xab   : > { %5295 = vmatprep.subr.msk.mxu0 %vm373_vm1, %v615_v47 }
  0xac   : > { %5296 = vmatpush1.msk.msra.mxu0 %vm373_vm1, %v614_v49 }
  0xad   : > { %5297 = vmatmul.mubr.msk.f32.vlgmr.msra.gmra.mrb[0].mxu0 %vm369_vm2, %v338_v48  ;;  %5298 = vmatprep.subr.msk.mxu0 %vm373_vm1, %v617_v50  ;;  %v610_v52 = vpop.permute.xlu0 %609  ;;  %v857_v53 = vpop.permute.xlu1 %856 }
  0xae   : > { %5299 = vmatpush1.msk.msra.mxu0 %vm373_vm1, %v616_v51  ;;  %v619_v54 = vsel %vm613_vm3, %v610_v52, %v612_v42  ;;  %770 = vmatprep.mubr.f32.mxu0 %v5659_v0  ;;  %v618_v55 = vsel %vm613_vm3, %v608_v37, %v610_v52  ;;  %v867_v3 = vsel %vm864_vm4, %v855_v46, %v857_v53 }
  0xaf   : > { %5301 = vmatprep.subr.msk.mxu0 %vm373_vm1, %v619_v54 }
  0xb1   : > { %5300 = vmatmul.mubr.msk.f32.vlgmr.msra.gmra.mrb[2].mxu0 %vm369_vm2, %v338_v48  ;;  %v853_v56 = vpop.permute.xlu0 %852  ;;  %v861_v57 = vpop.permute.xlu1 %860 }
  0xb2   : > { %5302 = vmatpush1.msk.msra.mxu0 %vm373_vm1, %v618_v55  ;;  %v866_v58 = vsel %vm864_vm4, %v853_v56, %v855_v46  ;;  %841 = vmatprep.mubr.f32.mxu0 %v5659_v0  ;;  %v5344_v46 = vld [vmem:[%s6413_s1 + $0x30] sm:$0xff] }
  0xb3   : > { %5305 = vmatprep.subr.msk.mxu0 %vm373_vm1, %v866_v58  ;;  %v5354_v58 = vld [vmem:[%s6413_s1 + $0x38] sm:$0xff] }
  0xb5   : > { %5303 = vmatmul.mubr.msk.f32.vlgmr.msra.gmra.mrb[4].mxu0 %vm369_vm2, %v338_v48  ;;  %v851_v59 = vpop.permute.xlu0 %850  ;;  %v1110_v60 = vpop.permute.xlu1 %1109 }
  0xb6   : > { %v865_v61 = vsel %vm864_vm4, %v851_v59, %v853_v56  ;;  %950 = vmatprep.mubr.f32.mxu0 %v5659_v0 }
  0xb7   : > { %5306 = vmatpush1.msk.msra.mxu0 %vm373_vm1, %v865_v61 }
  0xb9   : > { %5307 = vmatmul.mubr.msk.f32.vlgmr.msra.gmra.mrb[0].mxu0 %vm369_vm2, %v5304_v62  ;;  %v859_v63 = vpop.permute.xlu0 %858  ;;  %v1108_v1 = vpop.permute.xlu1 %1107 }
  0xba   : > { %v868_v2 = vsel %vm864_vm4, %v857_v53, %v859_v63  ;;  %1021 = vmatprep.mubr.f32.mxu0 %v5659_v0  ;;  %v869_v7 = vsel %vm864_vm4, %v859_v63, %v861_v57  ;;  %v1122_v18 = vsel %vm1121_vm5, %v1108_v1, %v1110_v60 }
  0xbb   : > { %5308 = vmatprep.subr.msk.mxu0 %vm373_vm1, %v868_v2 }
  0xbc   : > { %5309 = vmatpush1.msk.msra.mxu0 %vm373_vm1, %v867_v3 }
  0xbd   : > { %5310 = vmatmul.mubr.msk.f32.vlgmr.msra.gmra.mrb[2].mxu0 %vm369_vm2, %v5304_v62  ;;  %v863_v4 = vpop.permute.xlu0 %862  ;;  %v1116_v5 = vpop.permute.xlu1 %1115 }
  0xbe   : > { %v870_v6 = vsel %vm864_vm4, %v861_v57, %v863_v4  ;;  %1092 = vmatprep.mubr.f32.mxu0 %v5659_v0 }
  0xbf   : > { %5311 = vmatprep.subr.msk.mxu0 %vm373_vm1, %v870_v6 }
  0xc0   : > { %5312 = vmatpush1.msk.msra.mxu0 %vm373_vm1, %v869_v7  ;;  %v5364_v7 = vld [vmem:[%s6413_s1 + $0x40] sm:$0xff] }
  0xc1   : > { %5313 = vmatmul.mubr.msk.f32.vlgmr.msra.gmra.mrb[4].mxu0 %vm369_vm2, %v5304_v62  ;;  %v1112_v8 = vpop.permute.xlu0 %1111  ;;  %v1120_v9 = vpop.permute.xlu1 %1119 }
  0xc2   : > { %v1123_v10 = vsel %vm1121_vm5, %v1110_v60, %v1112_v8  ;;  %1207 = vmatprep.mubr.f32.mxu0 %v5659_v0 }
  0xc3   : > { %5315 = vmatprep.subr.msk.mxu0 %vm373_vm1, %v1123_v10 }
  0xc4   : > { %5316 = vmatpush1.msk.msra.mxu0 %vm373_vm1, %v1122_v18 }
  0xc5   : > { %5317 = vmatmul.mubr.msk.f32.vlgmr.msra.gmra.mrb[0].mxu0 %vm369_vm2, %v5314_v17  ;;  %v1114_v19 = vpop.permute.xlu0 %1113  ;;  %v1619_v20 = vpop.permute.xlu1 %1618 }
  0xc6   : > { %v1124_v21 = vsel %vm1121_vm5, %v1112_v8, %v1114_v19  ;;  %v1125_v22 = vsel %vm1121_vm5, %v1114_v19, %v1116_v5  ;;  %1278 = vmatprep.mubr.f32.mxu0 %v5659_v0  ;;  %v2659_v19 = vlaneseq }
  0xc7   : > { %5318 = vmatprep.subr.msk.mxu0 %vm373_vm1, %v1125_v22 }
  0xc8   : > { %5319 = vmatpush1.msk.msra.mxu0 %vm373_vm1, %v1124_v21 }
  0xc9   : > { %5320 = vmatmul.mubr.msk.f32.vlgmr.msra.gmra.mrb[2].mxu0 %vm369_vm2, %v5314_v17  ;;  %v1118_v23 = vpop.permute.xlu0 %1117  ;;  %v1621_v24 = vpop.permute.xlu1 %1620 }
  0xca   : > { %v1126_v25 = vsel %vm1121_vm5, %v1116_v5, %v1118_v23  ;;  %v1127_v26 = vsel %vm1121_vm5, %v1118_v23, %v1120_v9  ;;  %1349 = vmatprep.mubr.f32.mxu0 %v5659_v0  ;;  %v1631_v34 = vsel %vm1628_vm6, %v1619_v20, %v1621_v24  ;;  %v310_v23 = vld [vmem:[%s6419_s7] sm:$0x3f] }
  0xcb   : > { %5321 = vmatprep.subr.msk.mxu0 %vm373_vm1, %v1127_v26 }
  0xcc   : > { %5322 = vmatpush1.msk.msra.mxu0 %vm373_vm1, %v1126_v25 }
  0xcd   : > { %5323 = vmatmul.mubr.msk.f32.vlgmr.msra.gmra.mrb[4].mxu0 %vm369_vm2, %v5314_v17  ;;  %v1617_v27 = vpop.permute.xlu0 %1616  ;;  %5325 = vmatprep.subr.msk.mxu0 %vm373_vm1, %v5792_v14  ;;  %v1625_v28 = vpop.permute.xlu1 %1624 }
  0xce   : > { %5326 = vmatpush1.msk.msra.mxu0 %vm373_vm1, %v5780_v12  ;;  %1443 = vmatprep.mubr.f32.mxu0 %v5659_v0  ;;  %v1630_v32 = vsel %vm1628_vm6, %v1617_v27, %v1619_v20  ;;  %v2660_v20 = vshrl.u32 %v2659_v19, 7 }
  0xcf   : > { %5328 = vmatprep.subr.msk.mxu0 %vm373_vm1, %v5798_v15 }
  0xd0   : > { %v2661_v21 = vsub.s32 0, %v2660_v20 }
  0xd1   : > { %5327 = vmatmul.mubr.msk.f32.vlgmr.msra.gmra.mrb[0].mxu0 %vm369_vm2, %v5324_v29  ;;  %v1615_v30 = vpop.permute.xlu0 %1614  ;;  %v1874_v31 = vpop.permute.xlu1 %1873 }
  0xd2   : > { %5329 = vmatpush1.msk.msra.mxu0 %vm373_vm1, %v5778_v11  ;;  %1514 = vmatprep.mubr.f32.mxu0 %v5659_v0  ;;  %v1629_v11 = vsel %vm1628_vm6, %v1615_v30, %v1617_v27 }
  0xd3   : > { %5331 = vmatprep.subr.msk.mxu0 %vm373_vm1, %v5804_v16 }
  0xd5   : > { %5330 = vmatmul.mubr.msk.f32.vlgmr.msra.gmra.mrb[2].mxu0 %vm369_vm2, %v5324_v29  ;;  %v1623_v12 = vpop.permute.xlu0 %1622  ;;  %v1872_v14 = vpop.permute.xlu1 %1871 }
  0xd6   : > { %5332 = vmatpush1.msk.msra.mxu0 %vm373_vm1, %v5786_v13  ;;  %1585 = vmatprep.mubr.f32.mxu0 %v5659_v0  ;;  %v1632_v16 = vsel %vm1628_vm6, %v1621_v24, %v1623_v12  ;;  %v5334_v13 = vld [vmem:[%s6413_s1 + $0x28] sm:$0xff]  ;;  %v1633_v38 = vsel %vm1628_vm6, %v1623_v12, %v1625_v28  ;;  %v1886_v43 = vsel %vm1885_vm7, %v1872_v14, %v1874_v31  ;;  %v2665_v24 = vsub.s32 1, %v2660_v20 }
  0xd7   : > { %5335 = vmatprep.subr.msk.mxu0 %vm373_vm1, %v1630_v32  ;;  %v2673_v12 = vsub.s32 3, %v2660_v20 }
  0xd9   : > { %5333 = vmatmul.mubr.msk.f32.vlgmr.msra.gmra.mrb[4].mxu0 %vm369_vm2, %v5324_v29  ;;  %v1627_v15 = vpop.permute.xlu0 %1626  ;;  %v1880_v33 = vpop.permute.xlu1 %1879  ;;  %v2669_v29 = vsub.s32 2, %v2660_v20 }
  0xda   : > { %5336 = vmatpush1.msk.msra.mxu0 %vm373_vm1, %v1629_v11  ;;  %1714 = vmatprep.mubr.f32.mxu0 %v5659_v0  ;;  %v1634_v37 = vsel %vm1628_vm6, %v1625_v28, %v1627_v15  ;;  %v2662_v28 = vrot.slane %v310_v23, %v2661_v21 }
  0xdb   : > { %5338 = vmatprep.subr.msk.mxu0 %vm373_vm1, %v1632_v16  ;;  %v2670_v16 = vrot.slane %v310_v23, %v2669_v29  ;;  %v5381_v29 = vld [vmem:[%s6415_s3 + $0x10] sm:$0xff] }
  0xdd   : > { %5337 = vmatmul.mubr.msk.f32.vlgmr.msra.gmra.mrb[0].mxu0 %vm369_vm2, %v5334_v13  ;;  %v1876_v35 = vpop.permute.xlu0 %1875  ;;  %v1884_v36 = vpop.permute.xlu1 %1883 }
  0xde   : > { %5339 = vmatpush1.msk.msra.mxu0 %vm373_vm1, %v1631_v34  ;;  %1785 = vmatprep.mubr.f32.mxu0 %v5659_v0  ;;  %v1887_v41 = vsel %vm1885_vm7, %v1874_v31, %v1876_v35  ;;  %v2666_v31 = vrot.slane %v310_v23, %v2665_v24  ;;  %v2677_v34 = vsub.s32 4, %v2660_v20 }
  0xdf   : > { %5341 = vmatprep.subr.msk.mxu0 %vm373_vm1, %v1634_v37  ;;  %v2674_v37 = vrot.slane %v310_v23, %v2673_v12 }
  0xe1   : > { %5340 = vmatmul.mubr.msk.f32.vlgmr.msra.gmra.mrb[2].mxu0 %vm369_vm2, %v5334_v13  ;;  %v1878_v39 = vpop.permute.xlu0 %1877  ;;  %v2133_v40 = vpop.permute.xlu1 %2132 }
  0xe2   : > { %5342 = vmatpush1.msk.msra.mxu0 %vm373_vm1, %v1633_v38  ;;  %1856 = vmatprep.mubr.f32.mxu0 %v5659_v0  ;;  %v1889_v42 = vsel %vm1885_vm7, %v1878_v39, %v1880_v33  ;;  %v1888_v48 = vsel %vm1885_vm7, %v1876_v35, %v1878_v39  ;;  %v2681_v38 = vsub.s32 5, %v2660_v20 }
  0xe3   : > { %5345 = vmatprep.subr.msk.mxu0 %vm373_vm1, %v1887_v41 }
  0xe5   : > { %5343 = vmatmul.mubr.msk.f32.vlgmr.msra.gmra.mrb[4].mxu0 %vm369_vm2, %v5334_v13  ;;  %v1882_v44 = vpop.permute.xlu0 %1881  ;;  %v2135_v45 = vpop.permute.xlu1 %2134 }
  0xe6   : > { %5346 = vmatpush1.msk.msra.mxu0 %vm373_vm1, %v1886_v43  ;;  %1971 = vmatprep.mubr.f32.mxu0 %v5659_v0  ;;  %v1891_v47 = vsel %vm1885_vm7, %v1882_v44, %v1884_v36  ;;  %v1890_v52 = vsel %vm1885_vm7, %v1880_v33, %v1882_v44  ;;  %v2145_v60 = vsel %vm2142_vm8, %v2133_v40, %v2135_v45 }
  0xe7   : > { %5348 = vmatprep.subr.msk.mxu0 %vm373_vm1, %v1889_v42  ;;  %v2678_v44 = vrot.slane %v310_v23, %v2677_v34 }
  0xe9   : > { %5347 = vmatmul.mubr.msk.f32.vlgmr.msra.gmra.mrb[0].mxu0 %vm369_vm2, %v5344_v46  ;;  %v2131_v49 = vpop.permute.xlu0 %2130  ;;  %v2139_v50 = vpop.permute.xlu1 %2138 }
  0xea   : > { %5349 = vmatpush1.msk.msra.mxu0 %vm373_vm1, %v1888_v48  ;;  %2042 = vmatprep.mubr.f32.mxu0 %v5659_v0  ;;  %v2144_v51 = vsel %vm2142_vm8, %v2131_v49, %v2133_v40  ;;  %v2682_v48 = vrot.slane %v310_v23, %v2681_v38  ;;  %v5385_v38 = vld [vmem:[%s6415_s3 + $0x18] sm:$0xff] }
  0xeb   : > { %5351 = vmatprep.subr.msk.mxu0 %vm373_vm1, %v1891_v47 }
  0xed   : > { %5350 = vmatmul.mubr.msk.f32.vlgmr.msra.gmra.mrb[2].mxu0 %vm369_vm2, %v5344_v46  ;;  %v2129_v53 = vpop.permute.xlu0 %2128  ;;  %v2388_v54 = vpop.permute.xlu1 %2387 }
  0xee   : > { %5352 = vmatpush1.msk.msra.mxu0 %vm373_vm1, %v1890_v52  ;;  %2113 = vmatprep.mubr.f32.mxu0 %v5659_v0  ;;  %v2143_v55 = vsel %vm2142_vm8, %v2129_v53, %v2131_v49  ;;  %v4941_v53 = vld [vmem:[%s6416_s4] sm:$0xff] }
  0xef   : > { %5355 = vmatprep.subr.msk.mxu0 %vm373_vm1, %v2144_v51 }
  0xf1   : > { %5353 = vmatmul.mubr.msk.f32.vlgmr.msra.gmra.mrb[4].mxu0 %vm369_vm2, %v5344_v46  ;;  %v2137_v56 = vpop.permute.xlu0 %2136  ;;  %v2386_v59 = vpop.permute.xlu1 %2385 }
  0xf2   : > { %5356 = vmatpush1.msk.msra.mxu0 %vm373_vm1, %v2143_v55  ;;  %v2146_v57 = vsel %vm2142_vm8, %v2135_v45, %v2137_v56  ;;  %2228 = vmatprep.mubr.f32.mxu0 %v5659_v0  ;;  %v2147_v63 = vsel %vm2142_vm8, %v2137_v56, %v2139_v50  ;;  %v2400_v4 = vsel %vm2399_vm9, %v2386_v59, %v2388_v54  ;;  %v4954_v55 = vld [vmem:[%s6418_s6] sm:$0xff] }
  0xf3   : > { %5358 = vmatprep.subr.msk.mxu0 %vm373_vm1, %v2146_v57 }
  0xf5   : > { %5357 = vmatmul.mubr.msk.f32.vlgmr.msra.gmra.mrb[0].mxu0 %vm369_vm2, %v5354_v58  ;;  %v2141_v61 = vpop.permute.xlu0 %2140  ;;  %v2394_v2 = vpop.permute.xlu1 %2393 }
  0xf6   : > { %5359 = vmatpush1.msk.msra.mxu0 %vm373_vm1, %v2145_v60  ;;  %v2148_v62 = vsel %vm2142_vm8, %v2139_v50, %v2141_v61  ;;  %2299 = vmatprep.mubr.f32.mxu0 %v5659_v0 }
  0xf7   : > { %5361 = vmatprep.subr.msk.mxu0 %vm373_vm1, %v2148_v62 }
  0xf9   : > { %5360 = vmatmul.mubr.msk.f32.vlgmr.msra.gmra.mrb[2].mxu0 %vm369_vm2, %v5354_v58  ;;  %v2390_v1 = vpop.permute.xlu0 %2389  ;;  %v2398_v8 = vpop.permute.xlu1 %2397 }
  0xfa   : > { %5362 = vmatpush1.msk.msra.mxu0 %vm373_vm1, %v2147_v63  ;;  %v2401_v3 = vsel %vm2399_vm9, %v2388_v54, %v2390_v1  ;;  %2370 = vmatprep.mubr.f32.mxu0 %v5659_v0  ;;  %v6205_v63 = vld [vmem:[%s6415_s3 + $0x8] sm:$0xff] }
  0xfb   : > { %5365 = vmatprep.subr.msk.mxu0 %vm373_vm1, %v2401_v3 }
  0xfd   : > { %5363 = vmatmul.mubr.msk.f32.vlgmr.msra.gmra.mrb[4].mxu0 %vm369_vm2, %v5354_v58  ;;  %v2392_v5 = vpop.permute.xlu0 %2391  ;;  %v2962_v54 = vpop.permute.xlu1 %2961 }
  0xfe   : > { %5366 = vmatpush1.msk.msra.mxu0 %vm373_vm1, %v2400_v4  ;;  %v2403_v6 = vsel %vm2399_vm9, %v2392_v5, %v2394_v2  ;;  %2485 = vmatprep.mubr.f32.mxu0 %v5659_v0  ;;  %v2402_v9 = vsel %vm2399_vm9, %v2390_v1, %v2392_v5 }
  0xff   : > { %5368 = vmatprep.subr.msk.mxu0 %vm373_vm1, %v2403_v6 }
 0x101   : > { %5367 = vmatmul.mubr.msk.f32.vlgmr.msra.gmra.mrb[0].mxu0 %vm369_vm2, %v5364_v7  ;;  %v2396_v10 = vpop.permute.xlu0 %2395 }
 0x102   : > { %5369 = vmatpush1.msk.msra.mxu0 %vm373_vm1, %v2402_v9  ;;  %v2405_v17 = vsel %vm2399_vm9, %v2396_v10, %v2398_v8  ;;  %2556 = vmatprep.mubr.f32.mxu0 %v5659_v0  ;;  %v2404_v18 = vsel %vm2399_vm9, %v2394_v2, %v2396_v10 }
 0x103   : > { %5371 = vmatprep.subr.msk.mxu0 %vm373_vm1, %v2405_v17  ;;  %v2708_v17 = vld [vmem:[%s6415_s3] sm:$0xff] }
 0x105   : > { %5370 = vmatmul.mubr.msk.f32.vlgmr.msra.gmra.mrb[2].mxu0 %vm369_vm2, %v5364_v7 }
 0x106   : > { %5372 = vmatpush1.msk.msra.mxu0 %vm373_vm1, %v2404_v18  ;;  %2627 = vmatprep.mubr.f32.mxu0 %v5659_v0 }
 0x109   : > { %5373 = vmatmul.mubr.msk.f32.vlgmr.msra.gmra.mrb[4].mxu0 %vm369_vm2, %v5364_v7 }
 0x10a   : > { %2812 = vmatprep.mubr.f32.mxu0 %v5659_v0 }
 0x112   : > { %v2644_v22 = vpop.permute.xlu0 %2643 }
 0x1d4   : > { %v2487_v25 = vpop.f32.mrb[0].mxu0 }
 0x1d5   : > { %v2646_v26 = vadd.f32 %v2644_v22, %v2487_v25  ;;  %v2489_v27 = vpop.f32.mrb[1].mxu0 }
 0x1d6   : > { %v2647_v30 = vadd.f32 %v2644_v22, %v2489_v27 }
 0x1d7   : > { %v2652_v14 = vmax.f32 %v2646_v26, 0.0 }
 0x1d8   : > { %v2653_v32 = vmax.f32 %v2647_v30, 0.0  ;;  %v2558_v11 = vpop.f32.mrb[2].mxu0 }
 0x1d9   : > { %v6065_v15 = vmul.f32 %v2662_v28, %v2652_v14  ;;  %v2648_v33 = vadd.f32 %v2644_v22, %v2558_v11  ;;  %v2560_v13 = vpop.f32.mrb[3].mxu0 }
 0x1da   : > { %v6067_v35 = vmul.f32 %v2666_v31, %v2653_v32  ;;  %v2649_v36 = vadd.f32 %v2644_v22, %v2560_v13  ;;  %v6244_v13 = vld [vmem:[#allocation2] sm:$0xff] }
 0x1db   : > { %2695 = vst [vmem:[#allocation2 + $0x8] sm:$0xff] %v6065_v15  ;;  %v2654_v39 = vmax.f32 %v2648_v33, 0.0  ;;  %2963 = vrot.lane.b32.xlu1 %v6065_v15, %s5661_s23 }
 0x1dc   : > { %2696 = vst [vmem:[#allocation2 + $0x10] sm:$0xff] %v6067_v35  ;;  %v2655_v40 = vmax.f32 %v2649_v36, 0.0  ;;  %v2629_v41 = vpop.f32.mrb[4].mxu0  ;;  %2722 = vrot.lane.b32.xlu0 %v6067_v35, %s5660_s22 }
 0x1dd   : > { %v6075_v42 = vmul.f32 %v2670_v16, %v2654_v39  ;;  %v2650_v43 = vadd.f32 %v2644_v22, %v2629_v41  ;;  %v2631_v45 = vpop.f32.mrb[5].mxu0 }
 0x1de   : > { %v6077_v46 = vmul.f32 %v2674_v37, %v2655_v40  ;;  %v2651_v47 = vadd.f32 %v2644_v22, %v2631_v45 }
 0x1df   : > { %2697 = vst [vmem:[#allocation2 + $0x18] sm:$0xff] %v6075_v42  ;;  %v2656_v49 = vmax.f32 %v2650_v43, 0.0  ;;  %2724 = vrot.lane.b32.xlu1 %v6075_v42, %s5660_s22 }
 0x1e0   : > { %2698 = vst [vmem:[#allocation2 + $0x20] sm:$0xff] %v6077_v46  ;;  %v2657_v50 = vmax.f32 %v2651_v47, 0.0  ;;  %2965 = vrot.lane.b32.xlu0 %v6067_v35, %s5661_s23 }
 0x1e1   : > { %v6085_v51 = vmul.f32 %v2678_v44, %v2656_v49 }
 0x1e2   : > { %v6087_v52 = vmul.f32 %v2682_v48, %v2657_v50 }
 0x1e3   : > { %2699 = vst [vmem:[#allocation2 + $0x28] sm:$0xff] %v6085_v51  ;;  %2726 = vrot.lane.b32.xlu1 %v6077_v46, %s5660_s22 }
 0x1e4   : > { %2700 = vst [vmem:[#allocation2 + $0x30] sm:$0xff] %v6087_v52  ;;  %2730 = vrot.lane.b32.xlu0 %v6087_v52, %s5660_s22 }
 0x1e7   : > { %2728 = vrot.lane.b32.xlu1 %v6085_v51, %s5660_s22 }
 0x1e8   : > { %2967 = vrot.lane.b32.xlu0 %v6075_v42, %s5661_s23 }
 0x1eb   : > { %2969 = vrot.lane.b32.xlu1 %v6077_v46, %s5661_s23 }
 0x1ec   : > { %2971 = vrot.lane.b32.xlu0 %v6085_v51, %s5661_s23 }
 0x1ef   : > { %3209 = vrot.lane.b32.xlu1 %v6067_v35, %s5662_s24 }
 0x1f0   : > { %3207 = vrot.lane.b32.xlu0 %v6065_v15, %s5662_s24 }
 0x1f3   : > { %2973 = vrot.lane.b32.xlu1 %v6087_v52, %s5661_s23  ;;  %s297_s23 = sand.u32 1, %s5649_s28  }
 0x1f4   : > { %3205 = vrot.lane.b32.xlu0 %v5659_v0, %s5662_s24 }
 0x1f7   : > { %3211 = vrot.lane.b32.xlu1 %v6075_v42, %s5662_s24 }
 0x1f8   : > { %3213 = vrot.lane.b32.xlu0 %v6077_v46, %s5662_s24 }
 0x1fb   : > { %3215 = vrot.lane.b32.xlu1 %v6085_v51, %s5662_s24 }
 0x1fc   : > { %3217 = vrot.lane.b32.xlu0 %v6087_v52, %s5662_s24 }
 0x1ff   : > { %3457 = vrot.lane.b32.xlu1 %v6065_v15, %s5663_s25 }
 0x200   : > { %3459 = vrot.lane.b32.xlu0 %v6067_v35, %s5663_s25 }
 0x203   : > { %3455 = vrot.lane.b32.xlu1 %v5659_v0, %s5663_s25 }
 0x204   : > { %3461 = vrot.lane.b32.xlu0 %v6075_v42, %s5663_s25 }
 0x207   : > { %3463 = vrot.lane.b32.xlu1 %v6077_v46, %s5663_s25 }
 0x208   : > { %3465 = vrot.lane.b32.xlu0 %v6085_v51, %s5663_s25 }
 0x20b   : > { %3467 = vrot.lane.b32.xlu1 %v6087_v52, %s5663_s25  ;;  %s5421_s25 = smul.u32 768, %s5736_s9  ;;  %s5207_s9 = scalar_lea.sflag [#allocation4], %s297_s23 }
 0x20c   : > { %3945 = vrot.lane.b32.xlu0 %v6067_v35, %s5664_s26 }
 0x20f   : > { %3947 = vrot.lane.b32.xlu1 %v6075_v42, %s5664_s26 }
 0x210   : > { %3943 = vrot.lane.b32.xlu0 %v6065_v15, %s5664_s26 }
 0x213   : > { %3949 = vrot.lane.b32.xlu1 %v6077_v46, %s5664_s26 }
 0x214   : > { %3951 = vrot.lane.b32.xlu0 %v6085_v51, %s5664_s26 }
 0x217   : > { %4195 = vrot.lane.b32.xlu1 %v6067_v35, %s5665_s10 }
 0x218   : > { %3955 = vrot.lane.b32.xlu0 %v5659_v0, %s5664_s26 }
 0x21b   : > { %4193 = vrot.lane.b32.xlu1 %v6065_v15, %s5665_s10 }
 0x21c   : > { %4197 = vrot.lane.b32.xlu0 %v6075_v42, %s5665_s10 }
 0x21f   : > { %3953 = vrot.lane.b32.xlu1 %v6087_v52, %s5664_s26 }
 0x220   : > { %4199 = vrot.lane.b32.xlu0 %v6077_v46, %s5665_s10 }
 0x223   : > { %4201 = vrot.lane.b32.xlu1 %v6085_v51, %s5665_s10 }
 0x224   : > { %4445 = vrot.lane.b32.xlu0 %v6067_v35, %s5666_s12 }
 0x227   : > { %4205 = vrot.lane.b32.xlu1 %v5659_v0, %s5665_s10 }
 0x228   : > { %4203 = vrot.lane.b32.xlu0 %v6087_v52, %s5665_s10 }
 0x22b   : > { %4447 = vrot.lane.b32.xlu1 %v6075_v42, %s5666_s12 }
 0x22c   : > { %4443 = vrot.lane.b32.xlu0 %v6065_v15, %s5666_s12 }
 0x22f   : > { %4449 = vrot.lane.b32.xlu1 %v6077_v46, %s5666_s12 }
 0x230   : > { %4451 = vrot.lane.b32.xlu0 %v6085_v51, %s5666_s12 }
 0x233   : > { %4695 = vrot.lane.b32.xlu1 %v6067_v35, %s5667_s13 }
 0x234   : > { %4455 = vrot.lane.b32.xlu0 %v5659_v0, %s5666_s12 }
 0x237   : > { %4453 = vrot.lane.b32.xlu1 %v6087_v52, %s5666_s12 }
 0x238   : > { %4697 = vrot.lane.b32.xlu0 %v6075_v42, %s5667_s13 }
 0x23b   : > { %4693 = vrot.lane.b32.xlu1 %v6065_v15, %s5667_s13 }
 0x23c   : > { %4699 = vrot.lane.b32.xlu0 %v6077_v46, %s5667_s13 }
 0x23f   : > { %4701 = vrot.lane.b32.xlu1 %v6085_v51, %s5667_s13 }
 0x240   : > { %4703 = vrot.lane.b32.xlu0 %v6087_v52, %s5667_s13 }
 0x243   : > { %4705 = vrot.lane.b32.xlu1 %v5659_v0, %s5667_s13 }
 0x244   : > { %2720 = vrot.lane.b32.xlu0 %v6065_v15, %s5660_s22 }
 0x247   : > { %2718 = vrot.lane.b32.xlu1 %v5659_v0, %s5660_s22  ;;  %s6368_s22 = scalar_lea.hbm %s6420_s8, %s5421_s25 }
 0x248   : > { %4944 = vperm.xlu0 %5586, %v4941_v53   ;;  %v5389_v53 = vld [vmem:[%s6415_s3 + $0x20] sm:$0xff] }
 0x24b   : > { %4957 = vperm.xlu1 %5587, %v4954_v55  }
 0x24d   : > { %v2964_v56 = vpop.permute.xlu1 %2963 }
 0x24e   : > { %v6199_v57 = vpop.permute.xlu0 %2722  ;;  %v2975_v7 = vsel %vm613_vm3, %v2962_v54, %v2964_v56 }
 0x251   : > { %v2725_v58 = vpop.permute.xlu1 %2724 }
 0x252   : > { %v2966_v59 = vpop.permute.xlu0 %2965  ;;  %v2734_v1 = vsel %vm362_vm0, %v6199_v57, %v2725_v58 }
 0x253   : > { %v2976_v6 = vsel %vm613_vm3, %v2964_v56, %v2966_v59 }
 0x255   : > { %v2727_v60 = vpop.permute.xlu1 %2726 }
 0x256   : > { %v2731_v61 = vpop.permute.xlu0 %2730  ;;  %v2735_v62 = vsel %vm362_vm0, %v2725_v58, %v2727_v60 }
 0x257   : > { %2819 = vmatprep.subr.mxu1 %v2735_v62 }
 0x258   : > { %2820 = vmatpush1.msra.mxu1 %v2734_v1 }
 0x259   : > { %5376 = vmatmul.mubr.msk.f32.vlgmr.msra.gmra.mrb[0].mxu1 %vm2744_vm10, %v6205_v63  ;;  %v2729_v2 = vpop.permute.xlu1 %2728 }
 0x25a   : > { %v2736_v3 = vsel %vm362_vm0, %v2727_v60, %v2729_v2  ;;  %v2968_v4 = vpop.permute.xlu0 %2967  ;;  %v2737_v5 = vsel %vm362_vm0, %v2729_v2, %v2731_v61  ;;  %2954 = vmatprep.mubr.f32.mxu1 %v5659_v0 }
 0x25b   : > { %2890 = vmatprep.subr.mxu1 %v2737_v5  ;;  %v2977_v18 = vsel %vm613_vm3, %v2966_v59, %v2968_v4 }
 0x25c   : > { %2891 = vmatpush1.msra.mxu1 %v2736_v3 }
 0x25d   : > { %5377 = vmatmul.mubr.msk.f32.vlgmr.msra.gmra.mrb[2].mxu1 %vm2744_vm10, %v6205_v63  ;;  %2990 = vmatprep.subr.mxu1 %v2976_v6  ;;  %v2970_v8 = vpop.permute.xlu1 %2969 }
 0x25e   : > { %v2972_v9 = vpop.permute.xlu0 %2971  ;;  %2991 = vmatpush1.msra.mxu1 %v2975_v7  ;;  %v2978_v10 = vsel %vm613_vm3, %v2968_v4, %v2970_v8  ;;  %3054 = vmatprep.mubr.f32.mxu1 %v5659_v0 }
 0x25f   : > { %3061 = vmatprep.subr.mxu1 %v2978_v10  ;;  %v2979_v24 = vsel %vm613_vm3, %v2970_v8, %v2972_v9 }
 0x261   : > { %5378 = vmatmul.mubr.msk.f32.vlgmr.msra.gmra.mrb[4].mxu1 %vm2744_vm10, %v2708_v17  ;;  %v3210_v19 = vpop.permute.xlu1 %3209 }
 0x262   : > { %3062 = vmatpush1.msra.mxu1 %v2977_v18  ;;  %v3208_v20 = vpop.permute.xlu0 %3207  ;;  %3125 = vmatprep.mubr.f32.mxu1 %v5659_v0 }
 0x263   : > { %v3220_v25 = vsel %vm864_vm4, %v3208_v20, %v3210_v19 }
 0x265   : > { %5379 = vmatmul.mubr.msk.f32.vlgmr.msra.gmra.mrb[0].mxu1 %vm2744_vm10, %v2708_v17  ;;  %v2974_v21 = vpop.permute.xlu1 %2973 }
 0x266   : > { %v3206_v22 = vpop.permute.xlu0 %3205  ;;  %v2980_v23 = vsel %vm613_vm3, %v2972_v9, %v2974_v21  ;;  %3196 = vmatprep.mubr.f32.mxu1 %v5659_v0  ;;  %v5397_v9 = vld [vmem:[%s6415_s3 + $0x30] sm:$0xff] }
 0x267   : > { %3132 = vmatprep.subr.mxu1 %v2980_v23  ;;  %v3219_v26 = vsel %vm864_vm4, %v3206_v22, %v3208_v20 }
 0x268   : > { %3133 = vmatpush1.msra.mxu1 %v2979_v24 }
 0x269   : > { %5380 = vmatmul.mubr.msk.f32.vlgmr.msra.gmra.mrb[2].mxu1 %vm2744_vm10, %v2708_v17  ;;  %3234 = vmatprep.subr.mxu1 %v3220_v25  ;;  %v3212_v27 = vpop.permute.xlu1 %3211 }
 0x26a   : > { %v3214_v28 = vpop.permute.xlu0 %3213  ;;  %3235 = vmatpush1.msra.mxu1 %v3219_v26  ;;  %3298 = vmatprep.mubr.f32.mxu1 %v5659_v0  ;;  %v3221_v31 = vsel %vm864_vm4, %v3210_v19, %v3212_v27 }
 0x26b   : > { %v3222_v30 = vsel %vm864_vm4, %v3212_v27, %v3214_v28 }
 0x26c   : > { %3305 = vmatprep.subr.mxu1 %v3222_v30 }
 0x26d   : > { %5382 = vmatmul.mubr.msk.f32.vlgmr.msra.gmra.mrb[4].mxu1 %vm2744_vm10, %v5381_v29  ;;  %v3216_v12 = vpop.permute.xlu1 %3215 }
 0x26e   : > { %3306 = vmatpush1.msra.mxu1 %v3221_v31  ;;  %v3218_v14 = vpop.permute.xlu0 %3217  ;;  %3369 = vmatprep.mubr.f32.mxu1 %v5659_v0  ;;  %v3223_v11 = vsel %vm864_vm4, %v3214_v28, %v3216_v12  ;;  %v5401_v28 = vld [vmem:[%s6415_s3 + $0x38] sm:$0xff] }
 0x26f   : > { %v3224_v32 = vsel %vm864_vm4, %v3216_v12, %v3218_v14 }
 0x270   : > { %3376 = vmatprep.subr.mxu1 %v3224_v32 }
 0x271   : > { %5383 = vmatmul.mubr.msk.f32.vlgmr.msra.gmra.mrb[0].mxu1 %vm2744_vm10, %v5381_v29  ;;  %v3458_v33 = vpop.permute.xlu1 %3457 }
 0x272   : > { %3377 = vmatpush1.msra.mxu1 %v3223_v11  ;;  %v3460_v16 = vpop.permute.xlu0 %3459  ;;  %3440 = vmatprep.mubr.f32.mxu1 %v6244_v13 }
 0x273   : > { %v3470_v34 = vsel %vm1121_vm5, %v3458_v33, %v3460_v16 }
 0x274   : > { %3484 = vmatprep.subr.mxu1 %v3470_v34 }
 0x275   : > { %5384 = vmatmul.mubr.msk.f32.vlgmr.msra.gmra.mrb[2].mxu1 %vm2744_vm10, %v5381_v29  ;;  %v3456_v0 = vpop.permute.xlu1 %3455 }
 0x276   : > { %v3469_v36 = vsel %vm1121_vm5, %v3456_v0, %v3458_v33  ;;  %v3462_v37 = vpop.permute.xlu0 %3461  ;;  %3548 = vmatprep.mubr.f32.mxu1 %v6244_v13 }
 0x277   : > { %3485 = vmatpush1.msra.mxu1 %v3469_v36  ;;  %v3471_v43 = vsel %vm1121_vm5, %v3460_v16, %v3462_v37 }
 0x279   : > { %5386 = vmatmul.mubr.msk.f32.vlgmr.msra.gmra.mrb[4].mxu1 %vm2744_vm10, %v5385_v38  ;;  %v3464_v39 = vpop.permute.xlu1 %3463 }
 0x27a   : > { %v3466_v40 = vpop.permute.xlu0 %3465  ;;  %v3472_v41 = vsel %vm1121_vm5, %v3462_v37, %v3464_v39  ;;  %3619 = vmatprep.mubr.f32.mxu1 %v6244_v13  ;;  %v5405_v37 = vld [vmem:[%s6415_s3 + $0x40] sm:$0xff] }
 0x27b   : > { %3555 = vmatprep.subr.mxu1 %v3472_v41  ;;  %v3473_v48 = vsel %vm1121_vm5, %v3464_v39, %v3466_v40 }
 0x27c   : > { %3556 = vmatpush1.msra.mxu1 %v3471_v43 }
 0x27d   : > { %5387 = vmatmul.mubr.msk.f32.vlgmr.msra.gmra.mrb[0].mxu1 %vm2744_vm10, %v5385_v38  ;;  %v3468_v44 = vpop.permute.xlu1 %3467 }
 0x27e   : > { %v3946_v45 = vpop.permute.xlu0 %3945  ;;  %v3474_v47 = vsel %vm1121_vm5, %v3466_v40, %v3468_v44  ;;  %3690 = vmatprep.mubr.f32.mxu1 %v6244_v13  ;;  %v5592_v44 = vld [vmem:[%s5771_s21] sm:$0xff] }
 0x27f   : > { %3626 = vmatprep.subr.mxu1 %v3474_v47 }
 0x280   : > { %3627 = vmatpush1.msra.mxu1 %v3473_v48 }
 0x281   : > { %5388 = vmatmul.mubr.msk.f32.vlgmr.msra.gmra.mrb[2].mxu1 %vm2744_vm10, %v5385_v38  ;;  %3708 = vmatprep.subr.mxu1 %v6067_v35  ;;  %v3948_v49 = vpop.permute.xlu1 %3947 }
 0x282   : > { %v3944_v50 = vpop.permute.xlu0 %3943  ;;  %3709 = vmatpush1.msra.mxu1 %v6065_v15  ;;  %3772 = vmatprep.mubr.f32.mxu1 %v6244_v13  ;;  %v3958_v56 = vsel %vm1628_vm6, %v3946_v45, %v3948_v49 }
 0x283   : > { %3779 = vmatprep.subr.mxu1 %v6077_v46  ;;  %v3957_v46 = vsel %vm1628_vm6, %v3944_v50, %v3946_v45  ;;  %v4963_v45 = vcombine.high %v5592_v44, %v5592_v44  ;;  %v5593_v50 = vld [vmem:[%s5771_s21 + $0x8] sm:$0xff] }
 0x285   : > { %5390 = vmatmul.mubr.msk.f32.vlgmr.msra.gmra.mrb[4].mxu1 %vm2744_vm10, %v5389_v53  ;;  %v3950_v54 = vpop.permute.xlu1 %3949 }
 0x286   : > { %3780 = vmatpush1.msra.mxu1 %v6075_v42  ;;  %v3952_v55 = vpop.permute.xlu0 %3951  ;;  %3843 = vmatprep.mubr.f32.mxu1 %v6244_v13  ;;  %v3959_v59 = vsel %vm1628_vm6, %v3948_v49, %v3950_v54 }
 0x287   : > { %3850 = vmatprep.subr.mxu1 %v6087_v52  ;;  %v3960_v52 = vsel %vm1628_vm6, %v3950_v54, %v3952_v55  ;;  %v5594_v54 = vld [vmem:[%s5771_s21 + $0x10] sm:$0xff]  ;;  %s5536_s21 = smul.u32 48, %s297_s23 }
 0x289   : > { %5391 = vmatmul.mubr.msk.f32.vlgmr.msra.gmra.mrb[0].mxu1 %vm2744_vm10, %v5389_v53  ;;  %v4196_v15 = vpop.permute.xlu1 %4195  ;;  %s299_s24 = scalar_lea.vmem [#allocation3], %s5536_s21 }
 0x28a   : > { %3851 = vmatpush1.msra.mxu1 %v6085_v51  ;;  %v3956_v35 = vpop.permute.xlu0 %3955  ;;  %3914 = vmatprep.mubr.f32.mxu1 %v6244_v13  ;;  %v5393_v51 = vld [vmem:[%s6415_s3 + $0x28] sm:$0xff]  ;;  %s5221_s26 = sshll.u32 %s299_s24, 4  ;;  %s6370_s26 = int_to_ptr.vmem [resolvable:$true] %s5221_s26 }
 0x28b   : > { %3972 = vmatprep.subr.mxu1 %v3958_v56  ;;  %s5595_s13 = scalar_lea.vmem %s6370_s26, 768  ;;  %p5602_p0 = scmp.lt.s32.totalorder %s6370_s26, %s5600_s20 }
 0x28c   : > { %p5596_p11 = scmp.ne.s32.totalorder %s6370_s26, %s5595_s13  ;;  %p5603_p1 = scmp.lt.s32.totalorder %s5601_s17, %s5595_s13 }
 0x28d   : > { %5392 = vmatmul.mubr.msk.f32.vlgmr.msra.gmra.mrb[2].mxu1 %vm2744_vm10, %v5389_v53  ;;  %v4194_v42 = vpop.permute.xlu1 %4193  ;;  %v4964_v53 = vcombine.high %v5593_v50, %v5593_v50 }
 0x28e   : > { %3973 = vmatpush1.msra.mxu1 %v3957_v46  ;;  %v4198_v58 = vpop.permute.xlu0 %4197  ;;  %4036 = vmatprep.mubr.f32.mxu1 %v6244_v13  ;;  %v4207_v5 = vsel %vm1885_vm7, %v4194_v42, %v4196_v15  ;;  %p5597_p12 = pnand %p5596_p11, %p5753_p5  ;;  %p5604_p2 = por %p5603_p1, %p5602_p0 }
 0x28f   : > { %4043 = vmatprep.subr.mxu1 %v3960_v52  ;;  %v4208_v4 = vsel %vm1885_vm7, %v4196_v15, %v4198_v58 }
 0x290   : > { %p5598_p13 = pneg %p5597_p12 }
 0x291   : > { %5394 = vmatmul.mubr.msk.f32.vlgmr.msra.gmra.mrb[4].mxu1 %vm2744_vm10, %v5393_v51  ;;  %v3954_v60 = vpop.permute.xlu1 %3953 }
 0x292   : > { %4044 = vmatpush1.msra.mxu1 %v3959_v59  ;;  %v4200_v61 = vpop.permute.xlu0 %4199  ;;  %v3962_v62 = vsel %vm1628_vm6, %v3954_v60, %v3956_v35  ;;  %4107 = vmatprep.mubr.f32.mxu1 %v6244_v13  ;;  %v3961_v1 = vsel %vm1628_vm6, %v3952_v55, %v3954_v60  ;;  %v4965_v55 = vcombine.high %v5594_v54, %v5594_v54  ;;  %p5605_p3 = pnand %p5604_p2, %p5598_p13 }
 0x293   : > { %4114 = vmatprep.subr.mxu1 %v3962_v62  ;;  %v4209_v10 = vsel %vm1885_vm7, %v4198_v58, %v4200_v61 }
 0x295   : > { %5395 = vmatmul.mubr.msk.f32.vlgmr.msra.gmra.mrb[0].mxu1 %vm2744_vm10, %v5393_v51  ;;  %v4202_v2 = vpop.permute.xlu1 %4201 }
 0x296   : > { %4115 = vmatpush1.msra.mxu1 %v3961_v1  ;;  %v4446_v3 = vpop.permute.xlu0 %4445  ;;  %4178 = vmatprep.mubr.f32.mxu1 %v6244_v13  ;;  %v4210_v8 = vsel %vm1885_vm7, %v4200_v61, %v4202_v2 }
 0x297   : > { %4222 = vmatprep.subr.mxu1 %v4208_v4 }
 0x299   : > { %5396 = vmatmul.mubr.msk.f32.vlgmr.msra.gmra.mrb[2].mxu1 %vm2744_vm10, %v5393_v51  ;;  %v4206_v6 = vpop.permute.xlu1 %4205 }
 0x29a   : > { %4223 = vmatpush1.msra.mxu1 %v4207_v5  ;;  %v4204_v7 = vpop.permute.xlu0 %4203  ;;  %4286 = vmatprep.mubr.f32.mxu1 %v6244_v13 }
 0x29b   : > { %4293 = vmatprep.subr.mxu1 %v4210_v8  ;;  %v4212_v19 = vsel %vm1885_vm7, %v4204_v7, %v4206_v6  ;;  %v4211_v20 = vsel %vm1885_vm7, %v4202_v2, %v4204_v7 }
 0x29d   : > { %5398 = vmatmul.mubr.msk.f32.vlgmr.msra.gmra.mrb[4].mxu1 %vm2744_vm10, %v5397_v9  ;;  %v4448_v17 = vpop.permute.xlu1 %4447 }
 0x29e   : > { %4294 = vmatpush1.msra.mxu1 %v4209_v10  ;;  %v4444_v18 = vpop.permute.xlu0 %4443  ;;  %4357 = vmatprep.mubr.f32.mxu1 %v6244_v13  ;;  %v4458_v23 = vsel %vm2142_vm8, %v4446_v3, %v4448_v17 }
 0x29f   : > { %4364 = vmatprep.subr.mxu1 %v4212_v19  ;;  %v4457_v24 = vsel %vm2142_vm8, %v4444_v18, %v4446_v3 }
 0x2a1   : > { %5399 = vmatmul.mubr.msk.f32.vlgmr.msra.gmra.mrb[0].mxu1 %vm2744_vm10, %v5397_v9  ;;  %v4450_v21 = vpop.permute.xlu1 %4449 }
 0x2a2   : > { %4365 = vmatpush1.msra.mxu1 %v4211_v20  ;;  %v4452_v22 = vpop.permute.xlu0 %4451  ;;  %4428 = vmatprep.mubr.f32.mxu1 %v6244_v13  ;;  %v4459_v29 = vsel %vm2142_vm8, %v4448_v17, %v4450_v21 }
 0x2a3   : > { %4472 = vmatprep.subr.mxu1 %v4458_v23  ;;  %v4460_v27 = vsel %vm2142_vm8, %v4450_v21, %v4452_v22 }
 0x2a5   : > { %5400 = vmatmul.mubr.msk.f32.vlgmr.msra.gmra.mrb[2].mxu1 %vm2744_vm10, %v5397_v9  ;;  %v4696_v25 = vpop.permute.xlu1 %4695 }
 0x2a6   : > { %4473 = vmatpush1.msra.mxu1 %v4457_v24  ;;  %v4456_v26 = vpop.permute.xlu0 %4455  ;;  %4536 = vmatprep.mubr.f32.mxu1 %v6244_v13 }
 0x2a7   : > { %4543 = vmatprep.subr.mxu1 %v4460_v27 }
 0x2a9   : > { %5402 = vmatmul.mubr.msk.f32.vlgmr.msra.gmra.mrb[4].mxu1 %vm2744_vm10, %v5401_v28  ;;  %v4454_v30 = vpop.permute.xlu1 %4453 }
 0x2aa   : > { %4544 = vmatpush1.msra.mxu1 %v4459_v29  ;;  %v4698_v31 = vpop.permute.xlu0 %4697  ;;  %v4462_v12 = vsel %vm2142_vm8, %v4454_v30, %v4456_v26  ;;  %4607 = vmatprep.mubr.f32.mxu1 %v6244_v13  ;;  %v4461_v14 = vsel %vm2142_vm8, %v4452_v22, %v4454_v30 }
 0x2ab   : > { %4614 = vmatprep.subr.mxu1 %v4462_v12  ;;  %v4708_v33 = vsel %vm2399_vm9, %v4696_v25, %v4698_v31 }
 0x2ad   : > { %5403 = vmatmul.mubr.msk.f32.vlgmr.msra.gmra.mrb[0].mxu1 %vm2744_vm10, %v5401_v28  ;;  %v4694_v32 = vpop.permute.xlu1 %4693 }
 0x2ae   : > { %4615 = vmatpush1.msra.mxu1 %v4461_v14  ;;  %v4700_v11 = vpop.permute.xlu0 %4699  ;;  %4678 = vmatprep.mubr.f32.mxu1 %v6244_v13  ;;  %v4707_v16 = vsel %vm2399_vm9, %v4694_v32, %v4696_v25 }
 0x2af   : > { %4722 = vmatprep.subr.mxu1 %v4708_v33  ;;  %v4709_v38 = vsel %vm2399_vm9, %v4698_v31, %v4700_v11 }
 0x2b1   : > { %5404 = vmatmul.mubr.msk.f32.vlgmr.msra.gmra.mrb[2].mxu1 %vm2744_vm10, %v5401_v28  ;;  %v4702_v34 = vpop.permute.xlu1 %4701 }
 0x2b2   : > { %4723 = vmatpush1.msra.mxu1 %v4707_v16  ;;  %v4704_v0 = vpop.permute.xlu0 %4703  ;;  %v4710_v36 = vsel %vm2399_vm9, %v4700_v11, %v4702_v34  ;;  %4786 = vmatprep.mubr.f32.mxu1 %v6244_v13 }
 0x2b3   : > { %4793 = vmatprep.subr.mxu1 %v4710_v36  ;;  %v4711_v47 = vsel %vm2399_vm9, %v4702_v34, %v4704_v0 }
 0x2b5   : > { %5406 = vmatmul.mubr.msk.f32.vlgmr.msra.gmra.mrb[4].mxu1 %vm2744_vm10, %v5405_v37  ;;  %v4706_v39 = vpop.permute.xlu1 %4705 }
 0x2b6   : > { %4794 = vmatpush1.msra.mxu1 %v4709_v38  ;;  %v2721_v40 = vpop.permute.xlu0 %2720  ;;  %v4712_v41 = vsel %vm2399_vm9, %v4704_v0, %v4706_v39  ;;  %4857 = vmatprep.mubr.f32.mxu1 %v6244_v13 }
 0x2b7   : > { %4864 = vmatprep.subr.mxu1 %v4712_v41  ;;  %v2733_v43 = vsel %vm362_vm0, %v2721_v40, %v6199_v57  ;;  %v4953_v57 = vld [vmem:[%s6417_s5] sm:$0xff] }
 0x2b8   : > { %2748 = vmatprep.subr.mxu0 %v2733_v43 }
 0x2b9   : > { %5407 = vmatmul.mubr.msk.f32.vlgmr.msra.gmra.mrb[0].mxu1 %vm2744_vm10, %v5405_v37  ;;  %v2719_v48 = vpop.permute.xlu1 %2718 }
 0x2ba   : > { %4865 = vmatpush1.msra.mxu1 %v4711_v47  ;;  %v2732_v49 = vsel %vm362_vm0, %v2719_v48, %v2721_v40  ;;  %4928 = vmatprep.mubr.f32.mxu1 %v6244_v13 }
 0x2bb   : > { %2749 = vmatpush1.msra.mxu0 %v2732_v49  ;;  %5409 = vmatprep.subr.msk.mxu1 %vm373_vm1, %v4963_v45 }
 0x2bc   : > { %5375 = vmatmul.mubr.msk.f32.vlgmr.msra.gmra.mrb[6].mxu0 %vm2744_vm10, %v6205_v63 }
 0x2bd   : > { %5408 = vmatmul.mubr.msk.f32.vlgmr.msra.gmra.mrb[2].mxu1 %vm2744_vm10, %v5405_v37 }
 0x2be   : > { %5410 = vmatpush1.msk.msra.mxu1 %vm373_vm1, %v5592_v44  ;;  %5045 = vmatprep.mubr.f32.mxu1 %v6244_v13 }
 0x2bf   : > { %5412 = vmatprep.subr.msk.mxu1 %vm373_vm1, %v4964_v53 }
 0x2c1   : > { %5411 = vmatmul.mubr.msk.f32.vlgmr.msra.gmra.mrb[4].mxu1 %vm369_vm2, %v4953_v57 }
 0x2c2   : > { %5413 = vmatpush1.msk.msra.mxu1 %vm373_vm1, %v5593_v50  ;;  %5116 = vmatprep.mubr.f32.mxu1 %v6244_v13 }
 0x2c3   : > { %5415 = vmatprep.subr.msk.mxu1 %vm373_vm1, %v4965_v55 }
 0x2c5   : > { %5414 = vmatmul.mubr.msk.f32.vlgmr.msra.gmra.mrb[0].mxu1 %vm369_vm2, %v4953_v57 }
 0x2c6   : > { %5416 = vmatpush1.msk.msra.mxu1 %vm373_vm1, %v5594_v54  ;;  %5187 = vmatprep.mubr.f32.mxu1 %v6244_v13 }
 0x2c7   : > { %v4945_v63 = vpop.permute.xlu0 %4944 }
 0x2c9   : > { %5417 = vmatmul.mubr.msk.f32.vlgmr.msra.gmra.mrb[2].mxu1 %vm369_vm2, %v4953_v57 }
 0x2ca   : > { %v4958_v46 = vpop.permute.xlu1 %4957 }
 0x2cb   : > { %v5428_v62 = vadd.f32 %v4958_v46, %v4945_v63 }
 0x38f   : > { %v2814_v15 = vpop.f32.mrb[6].mxu0 }
 0x390   : > { %v5422_v35 = vadd.f32 %v4945_v63, %v2814_v15  ;;  %v2816_v56 = vpop.f32.mrb[7].mxu0 }
 0x391   : > { %v5425_v42 = vadd.f32 %v4945_v63, %v2816_v56 }
 0x392   : > { %v5423_v58 = vadd.f32 %v5422_v35, %v4958_v46 }
 0x393   : > { %v5426_v52 = vadd.f32 %v5425_v42, %v4958_v46 }
 0x394   : > { %v5047_v51 = vpop.f32.mrb[4].mxu1 }
 0x395   : > { %v5424_v59 = vadd.f32 %v5423_v58, %v5047_v51  ;;  %v5049_v60 = vpop.f32.mrb[5].mxu1 }
 0x396   : > { %v5427_v61 = vadd.f32 %v5426_v52, %v5049_v60 }
 0x397   : > { %5200 = vst [vmem:[%s299_s24] sm:$0xff] %v5424_v59 }
 0x398   : > { %5201 = vst [vmem:[%s299_s24 + $0x8] sm:$0xff] %v5427_v61  ;;  %v5118_v13 = vpop.f32.mrb[0].mxu1 }
 0x399   : > { %v5429_v1 = vadd.f32 %v5428_v62, %v5118_v13  ;;  %v5120_v2 = vpop.f32.mrb[1].mxu1 }
 0x39a   : > { %v5431_v3 = vadd.f32 %v5428_v62, %v5120_v2 }
 0x39b   : > { %5202 = vst [vmem:[%s299_s24 + $0x10] sm:$0xff] %v5429_v1 }
 0x39c   : > { %5203 = vst [vmem:[%s299_s24 + $0x18] sm:$0xff] %v5431_v3  ;;  %v5189_v4 = vpop.f32.mrb[2].mxu1 }
 0x39d   : > { %v5433_v5 = vadd.f32 %v5428_v62, %v5189_v4  ;;  %v5191_v6 = vpop.f32.mrb[3].mxu1 }
 0x39e   : > { %v5435_v7 = vadd.f32 %v5428_v62, %v5191_v6 }
 0x39f   : > { %5204 = vst [vmem:[%s299_s24 + $0x20] sm:$0xff] %v5433_v5 }
 0x3a0   : > { %5205 = vst [vmem:[%s299_s24 + $0x28] sm:$0xff] %v5435_v7 }
 0x3a1   : > { %5608 = shalt.err (!%p5605_p3)
}
 0x3a2   : > { %s5609_s18 = scalar_lea.hbm %s6368_s22, 768  ;;  %s5613_s24 = scalar_lea.hbm %s6420_s8, 1536 }
 0x3a3   : > { %p5610_p4 = scmp.ne.s32.totalorder %s6368_s22, %s5609_s18  ;;  %p5614_p9 = scmp.lt.u32.totalorder %s6368_s22, %s6420_s8 }
 0x3a4   : > { %p5615_p10 = scmp.lt.u32.totalorder %s5613_s24, %s5609_s18  ;;  %p5617_p12 = scmp.lt.u32.totalorder %s5609_s18, %s6368_s22 }
 0x3a5   : > { %p5611_p7 = pnand %p5610_p4, %p5753_p5 }
 0x3a6   : > { %p5616_p11 = por %p5615_p10, %p5614_p9 }
 0x3a7   : > { %p5612_p8 = pneg %p5611_p7 }
 0x3a8   : > { %p5618_p13 = por %p5617_p12, %p5616_p11 }
 0x3aa   : > { %p5619_p0 = pnand %p5618_p13, %p5612_p8 }
 0x3ac   : > { %5622 = shalt.err (!%p5619_p0)
}
 0x3ad   : > { %5537 = dma.vmem_to_hbm [thread:$0]  (%p5753_p5), %s6370_s26, 768, %s6368_s22, %s5207_s9  }
 0x3ae PF: > { %p5543_p1 = scmp.ge.s32.totalorder %s5657_s30, 2  ;;  %s5233_s12 = sand.u32 1, %s5645_s27  }
 0x3af   : > { %s5234_s13 = scalar_lea.sflag [#allocation4], %s5233_s12 }
 0x3b0   : > { %p5540_p2 = pnand %p5543_p1, %p5757_p6 }
 0x3b2   : > { %5640 = dma.done.wait (!%p5540_p2), %s5234_s13, 768  }
 0x3b3   : > { %5642 = vsyncadd (!%p5540_p2), %s5234_s13, 4294966528  ;;  %p18_p3 = scmp.ge.s32.totalorder %s5740_s11, 4   ;;  %s6423_s27 = smov %s5649_s28 }
 0x3b4   : > { %s6424_s28 = smov %s5653_s29  ;;  %s6425_s29 = smov %s5751_s14 }
 0x3b5   : > { %s6426_s30 = smov %s5740_s11  ;;  %20 = sbr.rel (!%p18_p3) target bundleno = 3 (0x3), region = 103 }
 0x3bc   :  { %5239 = vsyncpa [#allocation4], 1 }
 0x3bd   :  { %5241 = vsyncpa [#allocation4 + $0x1], 1 }

</bundles_post_ra>
